<compile_context>
chip_gen: v6e
topology: v6e:2x2x1
jax: 0.10.0
libtpu: 0.0.40
codegen_flags: <defaults>
</compile_context>

<pallas_src>
import jax
import jax.numpy as jnp
from jax.experimental import pallas as pl
from jax.experimental.pallas import tpu as pltpu

# ----------------------------- configuration --------------------------------
STATE_DIM = 32
MSG_DIM = 32
MAX_CHILDREN = 2
ACTION_DIM = 1          # module asserts action_dim == 1
MAX_ACTION = 1.0
HID1, HID2 = 400, 300   # MLPBase hidden sizes (SMP / ModularRL codebase)
HID1_P, HID2_P = 512, 384   # padded to 128-lane multiples (padding lanes are exact zeros)
EPS = 1e-12             # F.normalize eps

BATCH = 16              # whole batch processed in a single grid step

# ---- packed-buffer layout (all row offsets 16-sublane aligned for bf16) ----
# w64 slab (rows, 64 lanes): wm3 padded to 384 rows | w1 (32) | w2 (64) | w3->64 lanes (64)
_WM3_R, _W1_R, _W2_R, _W3_R = 0, 384, 416, 480
_W64_ROWS = 544
# aux (f32, 512 lanes) row layout: one parameter per row, state from row 16
_B1, _B2, _B3, _BA1, _BM1, _BA2, _BM2, _BM3, _WA3, _BA3 = range(10)
_STATE_R = 16
AUX_LANES = 512


# ------------------------------- kernel -------------------------------------
def _l2norm(v):
    ss = jnp.sum(v * v, axis=-1, keepdims=True)
    # 1/max(||v||, eps) == rsqrt(max(||v||^2, eps^2)); rsqrt runs on the EUP slot.
    return v * jax.lax.rsqrt(jnp.maximum(ss, EPS * EPS))


def actor_graph_kernel(aux_ref, w64_ref, w400_ref, w300_hbm, out_ref,
                       w300_vmem, w300_sem):
    f32 = jnp.float32

    # Kick off the largest weight transfer (layer-2 slab, ~0.75 MB bf16) immediately;
    # it is overlapped with the whole bottom-up stage + fused layer-1 matmul below.
    w300_cp = pltpu.make_async_copy(w300_hbm, w300_vmem, w300_sem)
    w300_cp.start()

    b = aux_ref.shape[0] - _STATE_R                       # padded batch (static)
    x = aux_ref[_STATE_R:_STATE_R + b, 0:STATE_DIM]       # state (B, 32) f32

    def bias(row, width):
        return aux_ref[row:row + 1, 0:width]              # (1, width) f32

    def mm(a, w):                                         # bf16 MXU, f32 accumulate
        return jnp.dot(a.astype(jnp.bfloat16), w, preferred_element_type=f32)

    # ---------------- bottom-up: ActorUp (child messages are zeros) ----------
    h = _l2norm(mm(x, w64_ref[_W1_R:_W1_R + STATE_DIM, :]) + bias(_B1, 64))   # (B,64)
    # xm = tanh(cat([h, zeros])): zero half dropped, fc2 weight pre-sliced to 64 rows
    xm = jnp.tanh(h)
    xm = jnp.tanh(mm(xm, w64_ref[_W2_R:_W2_R + 64, :]) + bias(_B2, 64))       # (B,64)
    # fc3 padded to 64 output lanes (upper 32 lanes exactly zero) -> padded msg_up
    msg_up = _l2norm(mm(xm, w64_ref[_W3_R:_W3_R + 64, :]) + bias(_B3, 64))    # (B,64)

    # --------------- top-down: ActorDownAction (parent msg slice is zeros) ---
    # xm2 == tanh(cat([msg_up, zeros(MSG_DIM)])) : padded lanes are exact zeros.
    xm2 = jnp.tanh(msg_up)                                                     # (B,64)

    # fused layer 1: one (B,64)x(64,1024) matmul; lanes 0:512 action, 512:1024 msg
    y1 = mm(xm2, w400_ref[...])                                                # (B,1024)
    a1 = jnp.maximum(y1[:, 0:HID1_P] + bias(_BA1, HID1_P), 0.0)                # (B,512)
    m1 = jnp.maximum(y1[:, HID1_P:2 * HID1_P] + bias(_BM1, HID1_P), 0.0)       # (B,512)

    # layer-2 weights only needed now; DMA was hidden behind everything above.
    w300_cp.wait()
    a2 = jnp.maximum(mm(a1, w300_vmem[0:HID1_P, :]) + bias(_BA2, HID2_P), 0.0)            # (B,384)
    m2 = jnp.maximum(mm(m1, w300_vmem[HID1_P:2 * HID1_P, :]) + bias(_BM2, HID2_P), 0.0)   # (B,384)

    # final action layer (out width 1): f32 VPU multiply + lane reduction
    wa3_row = aux_ref[_WA3:_WA3 + 1, 0:HID2_P]                                 # (1,384)
    ba3 = aux_ref[_BA3:_BA3 + 1, 0:1]                                          # (1,1)
    act_pre = jnp.sum(a2 * wa3_row, axis=-1, keepdims=True) + ba3              # (B,1)
    action = MAX_ACTION * jnp.tanh(act_pre)

    msg_down = _l2norm(
        mm(m2, w64_ref[_WM3_R:_WM3_R + HID2_P, :]) + bias(_BM3, 64))           # (B,64)

    # lane-dense fused output: msg_down in lanes 0:64, action broadcast to 64:128
    out_ref[...] = jnp.concatenate(
        [msg_down, jnp.broadcast_to(action, (b, 64))], axis=-1)                # (B,128)


# ------------------------------- wrapper -------------------------------------
def pack_params(p):
    """Pack the 19 per-layer tensors into 3 bf16 weight slabs + 1 f32 aux base slab."""
    md = MSG_DIM * MAX_CHILDREN

    w64 = jnp.zeros((_W64_ROWS, 64), jnp.float32)
    w64 = w64.at[_WM3_R:_WM3_R + HID2].set(p["wm3"])                    # (300,64); rows 300:384 zero
    w64 = w64.at[_W1_R:_W1_R + STATE_DIM].set(p["w1"])                  # (32,64)
    w64 = w64.at[_W2_R:_W2_R + 64].set(p["w2"][:64])                    # zero-concat rows dropped
    w64 = w64.at[_W3_R:_W3_R + 64].set(
        jnp.pad(p["w3"], ((0, 0), (0, 64 - MSG_DIM))))                  # out padded 32->64

    # fused top-down layer 1: lanes 0:512 = action branch, 512:1024 = msg branch
    w400 = jnp.zeros((2 * MSG_DIM, 2 * HID1_P), jnp.float32)
    w400 = w400.at[:, 0:HID1].set(p["wa1"])
    w400 = w400.at[:, HID1_P:HID1_P + HID1].set(p["wm1"])

    # layer 2: rows 0:512 = action branch, rows 512:1024 = msg branch (pads exact zeros)
    w300 = jnp.zeros((2 * HID1_P, HID2_P), jnp.float32)
    w300 = w300.at[0:HID1, 0:HID2].set(p["wa2"])
    w300 = w300.at[HID1_P:HID1_P + HID1, 0:HID2].set(p["wm2"])

    aux = jnp.zeros((_STATE_R, AUX_LANES), jnp.float32)
    aux = aux.at[_B1, 0:64].set(p["b1"][0])
    aux = aux.at[_B2, 0:64].set(p["b2"][0])
    aux = aux.at[_B3, 0:MSG_DIM].set(p["b3"][0])
    aux = aux.at[_BA1, 0:HID1].set(p["ba1"][0])
    aux = aux.at[_BM1, 0:HID1].set(p["bm1"][0])
    aux = aux.at[_BA2, 0:HID2].set(p["ba2"][0])
    aux = aux.at[_BM2, 0:HID2].set(p["bm2"][0])
    aux = aux.at[_BM3, 0:md].set(p["bm3"][0])
    aux = aux.at[_WA3, 0:HID2].set(p["wa3"][:, 0])
    aux = aux.at[_BA3, 0].set(p["ba3"][0, 0])

    bf = jnp.bfloat16
    return aux, w64.astype(bf), w400.astype(bf), w300.astype(bf)


@jax.jit
def actor_graph_policy_forward(state, aux_base, w64, w400, w300):
    """state: (B, STATE_DIM) float32. Returns (mean, msg_down)."""
    B = state.shape[0]
    Bp = ((B + 7) // 8) * 8                    # sublane-aligned batch
    md = MSG_DIM * MAX_CHILDREN

    # fold the state into the f32 aux slab (rows 16:16+Bp) -> one fewer input DMA
    state_pad = jnp.zeros((Bp, AUX_LANES), jnp.float32).at[:B, :STATE_DIM].set(state)
    aux = jnp.concatenate([aux_base, state_pad], axis=0)   # (16+Bp, 512)

    out = pl.pallas_call(
        actor_graph_kernel,
        out_shape=jax.ShapeDtypeStruct((Bp, 128), jnp.float32),
        grid=(1,),
        in_specs=[
            pl.BlockSpec(aux.shape, lambda i: (0, 0)),
            pl.BlockSpec(w64.shape, lambda i: (0, 0)),
            pl.BlockSpec(w400.shape, lambda i: (0, 0)),
            pl.BlockSpec(memory_space=pl.ANY),              # w300 stays in HBM; manual DMA
        ],
        out_specs=pl.BlockSpec((Bp, 128), lambda i: (0, 0)),
        scratch_shapes=[
            pltpu.VMEM((2 * HID1_P, HID2_P), jnp.bfloat16),  # layer-2 weight landing buffer
            pltpu.SemaphoreType.DMA(()),
        ],
        compiler_params=pltpu.CompilerParams(dimension_semantics=("arbitrary",)),
    )(aux, w64, w400, w300)

    msg_down = out[:B, :md]                    # (B, 64)
    action = out[:B, 64:64 + ACTION_DIM]       # (B, 1)

    # ---- glue replicating the PyTorch tail of forward() ----
    action = action[..., None]                 # stack over num_limbs=1 -> (B, 1, 1)
    msg_down = msg_down[..., None]             # (B, 64, 1)
    x = jnp.squeeze(action)                    # (B,)
    if x.ndim == 1:
        x = x[None, :]                         # (1, B)  -- mirrors unsqueeze(0)
    # dist = SafeTruncatedNormal(x, 0.05, -1, 1); ContDist(Independent(dist,1))
    # -> return the mean of that distribution.
    return x, msg_down


# ------------------------- deterministic parameters ---------------------------
def _linear_init(key, fan_in, fan_out):
    # mimic torch.nn.Linear default init: U(-1/sqrt(fan_in), 1/sqrt(fan_in))
    kw, kb = jax.random.split(key)
    bound = 1.0 / jnp.sqrt(float(fan_in))
    w = jax.random.uniform(kw, (fan_in, fan_out), jnp.float32, -bound, bound)
    b = jax.random.uniform(kb, (1, fan_out), jnp.float32, -bound, bound)
    return w, b


def make_params(key):
    keys = jax.random.split(key, 9)
    p = {}
    # ActorUp
    p["w1"], p["b1"] = _linear_init(keys[0], STATE_DIM, 64)
    p["w2"], p["b2"] = _linear_init(keys[1], 64 + MSG_DIM * MAX_CHILDREN, 64)
    p["w3"], p["b3"] = _linear_init(keys[2], 64, MSG_DIM)
    # ActorDownAction.action_base : MLPBase(msg_dim + msg_dim, action_dim)
    p["wa1"], p["ba1"] = _linear_init(keys[3], 2 * MSG_DIM, HID1)
    p["wa2"], p["ba2"] = _linear_init(keys[4], HID1, HID2)
    p["wa3"], p["ba3"] = _linear_init(keys[5], HID2, ACTION_DIM)
    # ActorDownAction.msg_base : MLPBase(msg_dim + msg_dim, msg_dim*max_children)
    p["wm1"], p["bm1"] = _linear_init(keys[6], 2 * MSG_DIM, HID1)
    p["wm2"], p["bm2"] = _linear_init(keys[7], HID1, HID2)
    p["wm3"], p["bm3"] = _linear_init(keys[8], HID2, MSG_DIM * MAX_CHILDREN)
    return p


# ------------------------------ pure-JAX reference ----------------------------
def reference_forward(state, p):
    def l2n(v):
        n = jnp.sqrt(jnp.sum(v * v, axis=-1, keepdims=True))
        return v / jnp.maximum(n, EPS)

    B = state.shape[0]
    h = l2n(state @ p["w1"] + p["b1"])
    m0 = jnp.zeros((B, MSG_DIM * MAX_CHILDREN), jnp.float32)
    xm = jnp.tanh(jnp.concatenate([h, m0], axis=-1))
    xm = jnp.tanh(xm @ p["w2"] + p["b2"])
    msg_up = l2n(xm @ p["w3"] + p["b3"])

    xm2 = jnp.tanh(jnp.concatenate([msg_up, jnp.zeros((B, MSG_DIM), jnp.float32)], axis=-1))
    a = jax.nn.relu(xm2 @ p["wa1"] + p["ba1"])
    a = jax.nn.relu(a @ p["wa2"] + p["ba2"])
    action = MAX_ACTION * jnp.tanh(a @ p["wa3"] + p["ba3"])
    md = jax.nn.relu(xm2 @ p["wm1"] + p["bm1"])
    md = jax.nn.relu(md @ p["wm2"] + p["bm2"])
    msg_down = l2n(md @ p["wm3"] + p["bm3"])

    x = jnp.squeeze(action[..., None])
    if x.ndim == 1:
        x = x[None, :]
    return x, msg_down[..., None]


# ----------------------------------- main -------------------------------------
if __name__ == "__main__":
    key = jax.random.PRNGKey(0)
    kp, ks = jax.random.split(key)
    params = make_params(kp)
    aux_base, w64, w400, w300 = pack_params(params)

    # observation; forward() slices state[:, :state_dim*num_limbs] == full width here
    state = jax.random.normal(ks, (BATCH, STATE_DIM), jnp.float32)

    mean, msg_down = actor_graph_policy_forward(state, aux_base, w64, w400, w300)
    jax.block_until_ready((mean, msg_down))

    ref_mean, ref_msg = reference_forward(state, params)
    assert mean.shape == (1, BATCH)
    assert msg_down.shape == (BATCH, MSG_DIM * MAX_CHILDREN, 1)
    # bf16 weight streaming (f32 accumulation) -> relaxed tolerance vs f32 reference
    assert jnp.allclose(mean, ref_mean, atol=3e-2, rtol=3e-2)
    assert jnp.allclose(msg_down, ref_msg, atol=3e-2, rtol=3e-2)

    print("KERNEL_OK")
</pallas_src>

<mosaic_0001>
module attributes {stable_mosaic.version = 11 : i64} {
  func.func @actor_graph_kernel(%arg0: i32, %arg1: memref<32x512xf32, #tpu.memory_space<vmem>>, %arg2: memref<544x64xbf16, #tpu.memory_space<vmem>>, %arg3: memref<64x1024xbf16, #tpu.memory_space<vmem>>, %arg4: memref<1024x384xbf16, #tpu.memory_space<any>>, %arg5: memref<16x128xf32, #tpu.memory_space<vmem>>, %arg6: memref<1024x384xbf16, #tpu.memory_space<vmem>>, %arg7: memref<!tpu.dma_semaphore, #tpu.memory_space<semaphore_mem>>) attributes {dimension_semantics = [#tpu.dimension_semantics<arbitrary>], iteration_bounds = array<i64: 1>, scalar_prefetch = 0 : i64, scratch_operands = 2 : i64, tpu.core_type = #tpu.core_type<tc>, window_params = [{pipeline_mode = #tpu.pipeline_mode<synchronous>, transform_indices = @transform_0, window_bounds = array<i64: 32, 512>}, {pipeline_mode = #tpu.pipeline_mode<synchronous>, transform_indices = @transform_1, window_bounds = array<i64: 544, 64>}, {pipeline_mode = #tpu.pipeline_mode<synchronous>, transform_indices = @transform_2, window_bounds = array<i64: 64, 1024>}, {}, {pipeline_mode = #tpu.pipeline_mode<synchronous>, transform_indices = @transform_4, window_bounds = array<i64: 16, 128>}]} {
    tpu.enqueue_dma source(%arg4 : memref<1024x384xbf16, #tpu.memory_space<any>>) target(%arg6 : memref<1024x384xbf16, #tpu.memory_space<vmem>>) target_semaphore(%arg7 : memref<!tpu.dma_semaphore, #tpu.memory_space<semaphore_mem>>)
    %c16 = arith.constant 16 : index
    %c0 = arith.constant 0 : index
    %0 = vector.load %arg1[%c16, %c0] : memref<32x512xf32, #tpu.memory_space<vmem>>, vector<16x32xf32>
    %c384 = arith.constant 384 : index
    %c0_0 = arith.constant 0 : index
    %1 = vector.load %arg2[%c384, %c0_0] : memref<544x64xbf16, #tpu.memory_space<vmem>>, vector<32x64xbf16>
    %2 = arith.truncf %0 : vector<16x32xf32> to vector<16x32xbf16>
    %cst = arith.constant dense<0.000000e+00> : vector<16x64xf32>
    %3 = tpu.matmul %2, %1, %cst {dimension_numbers = #tpu.dot_dimension_numbers<[1], [0], [0], [1], [0, 0, 1, 1], [], []>} : vector<16x32xbf16>, vector<32x64xbf16>, vector<16x64xf32> -> vector<16x64xf32>
    %c0_1 = arith.constant 0 : index
    %c0_2 = arith.constant 0 : index
    %4 = vector.load %arg1[%c0_1, %c0_2] : memref<32x512xf32, #tpu.memory_space<vmem>>, vector<1x64xf32>
    %5 = vector.broadcast %4 : vector<1x64xf32> to vector<16x64xf32>
    %6 = arith.addf %3, %5 : vector<16x64xf32>
    %7 = arith.mulf %6, %6 : vector<16x64xf32>
    %cst_3 = arith.constant dense<0.000000e+00> : vector<16xf32>
    %8 = vector.multi_reduction <add>, %7, %cst_3 [1] : vector<16x64xf32> to vector<16xf32>
    %9 = vector.shape_cast %8 : vector<16xf32> to vector<16x1xf32>
    %cst_4 = arith.constant 1.000000e-24 : f32
    %10 = vector.broadcast %cst_4 : f32 to vector<16x1xf32>
    %11 = arith.maximumf %9, %10 : vector<16x1xf32>
    %12 = math.rsqrt %11 : vector<16x1xf32>
    %13 = vector.broadcast %12 : vector<16x1xf32> to vector<16x64xf32>
    %14 = arith.mulf %6, %13 : vector<16x64xf32>
    %15 = math.tanh %14 : vector<16x64xf32>
    %c416 = arith.constant 416 : index
    %c0_5 = arith.constant 0 : index
    %16 = vector.load %arg2[%c416, %c0_5] : memref<544x64xbf16, #tpu.memory_space<vmem>>, vector<64x64xbf16>
    %17 = arith.truncf %15 : vector<16x64xf32> to vector<16x64xbf16>
    %cst_6 = arith.constant dense<0.000000e+00> : vector<16x64xf32>
    %18 = tpu.matmul %17, %16, %cst_6 {dimension_numbers = #tpu.dot_dimension_numbers<[1], [0], [0], [1], [0, 0, 1, 1], [], []>} : vector<16x64xbf16>, vector<64x64xbf16>, vector<16x64xf32> -> vector<16x64xf32>
    %c1 = arith.constant 1 : index
    %c0_7 = arith.constant 0 : index
    %19 = vector.load %arg1[%c1, %c0_7] : memref<32x512xf32, #tpu.memory_space<vmem>>, vector<1x64xf32>
    %20 = vector.broadcast %19 : vector<1x64xf32> to vector<16x64xf32>
    %21 = arith.addf %18, %20 : vector<16x64xf32>
    %22 = math.tanh %21 : vector<16x64xf32>
    %c480 = arith.constant 480 : index
    %c0_8 = arith.constant 0 : index
    %23 = vector.load %arg2[%c480, %c0_8] : memref<544x64xbf16, #tpu.memory_space<vmem>>, vector<64x64xbf16>
    %24 = arith.truncf %22 : vector<16x64xf32> to vector<16x64xbf16>
    %cst_9 = arith.constant dense<0.000000e+00> : vector<16x64xf32>
    %25 = tpu.matmul %24, %23, %cst_9 {dimension_numbers = #tpu.dot_dimension_numbers<[1], [0], [0], [1], [0, 0, 1, 1], [], []>} : vector<16x64xbf16>, vector<64x64xbf16>, vector<16x64xf32> -> vector<16x64xf32>
    %c2 = arith.constant 2 : index
    %c0_10 = arith.constant 0 : index
    %26 = vector.load %arg1[%c2, %c0_10] : memref<32x512xf32, #tpu.memory_space<vmem>>, vector<1x64xf32>
    %27 = vector.broadcast %26 : vector<1x64xf32> to vector<16x64xf32>
    %28 = arith.addf %25, %27 : vector<16x64xf32>
    %29 = arith.mulf %28, %28 : vector<16x64xf32>
    %cst_11 = arith.constant dense<0.000000e+00> : vector<16xf32>
    %30 = vector.multi_reduction <add>, %29, %cst_11 [1] : vector<16x64xf32> to vector<16xf32>
    %31 = vector.shape_cast %30 : vector<16xf32> to vector<16x1xf32>
    %cst_12 = arith.constant 1.000000e-24 : f32
    %32 = vector.broadcast %cst_12 : f32 to vector<16x1xf32>
    %33 = arith.maximumf %31, %32 : vector<16x1xf32>
    %34 = math.rsqrt %33 : vector<16x1xf32>
    %35 = vector.broadcast %34 : vector<16x1xf32> to vector<16x64xf32>
    %36 = arith.mulf %28, %35 : vector<16x64xf32>
    %37 = math.tanh %36 : vector<16x64xf32>
    %c0_13 = arith.constant 0 : index
    %c0_14 = arith.constant 0 : index
    %38 = vector.load %arg3[%c0_13, %c0_14] : memref<64x1024xbf16, #tpu.memory_space<vmem>>, vector<64x1024xbf16>
    %39 = arith.truncf %37 : vector<16x64xf32> to vector<16x64xbf16>
    %cst_15 = arith.constant dense<0.000000e+00> : vector<16x1024xf32>
    %40 = tpu.matmul %39, %38, %cst_15 {dimension_numbers = #tpu.dot_dimension_numbers<[1], [0], [0], [1], [0, 0, 1, 1], [], []>} : vector<16x64xbf16>, vector<64x1024xbf16>, vector<16x1024xf32> -> vector<16x1024xf32>
    %41 = vector.extract_strided_slice %40 {offsets = [0, 0], sizes = [16, 512], strides = [1, 1]} : vector<16x1024xf32> to vector<16x512xf32>
    %c3 = arith.constant 3 : index
    %c0_16 = arith.constant 0 : index
    %42 = vector.load %arg1[%c3, %c0_16] : memref<32x512xf32, #tpu.memory_space<vmem>>, vector<1x512xf32>
    %43 = vector.broadcast %42 : vector<1x512xf32> to vector<16x512xf32>
    %44 = arith.addf %41, %43 : vector<16x512xf32>
    %cst_17 = arith.constant 0.000000e+00 : f32
    %45 = vector.broadcast %cst_17 : f32 to vector<16x512xf32>
    %46 = arith.maximumf %44, %45 : vector<16x512xf32>
    %47 = vector.extract_strided_slice %40 {offsets = [0, 512], sizes = [16, 512], strides = [1, 1]} : vector<16x1024xf32> to vector<16x512xf32>
    %c4 = arith.constant 4 : index
    %c0_18 = arith.constant 0 : index
    %48 = vector.load %arg1[%c4, %c0_18] : memref<32x512xf32, #tpu.memory_space<vmem>>, vector<1x512xf32>
    %49 = vector.broadcast %48 : vector<1x512xf32> to vector<16x512xf32>
    %50 = arith.addf %47, %49 : vector<16x512xf32>
    %cst_19 = arith.constant 0.000000e+00 : f32
    %51 = vector.broadcast %cst_19 : f32 to vector<16x512xf32>
    %52 = arith.maximumf %50, %51 : vector<16x512xf32>
    tpu.wait_dma2 semaphore(%arg7 : memref<!tpu.dma_semaphore, #tpu.memory_space<semaphore_mem>>) src(%arg4 : memref<1024x384xbf16, #tpu.memory_space<any>>) dst(%arg6 : memref<1024x384xbf16, #tpu.memory_space<vmem>>)
    %c0_20 = arith.constant 0 : index
    %c0_21 = arith.constant 0 : index
    %53 = vector.load %arg6[%c0_20, %c0_21] : memref<1024x384xbf16, #tpu.memory_space<vmem>>, vector<512x384xbf16>
    %54 = arith.truncf %46 : vector<16x512xf32> to vector<16x512xbf16>
    %cst_22 = arith.constant dense<0.000000e+00> : vector<16x384xf32>
    %55 = tpu.matmul %54, %53, %cst_22 {dimension_numbers = #tpu.dot_dimension_numbers<[1], [0], [0], [1], [0, 0, 1, 1], [], []>} : vector<16x512xbf16>, vector<512x384xbf16>, vector<16x384xf32> -> vector<16x384xf32>
    %c5 = arith.constant 5 : index
    %c0_23 = arith.constant 0 : index
    %56 = vector.load %arg1[%c5, %c0_23] : memref<32x512xf32, #tpu.memory_space<vmem>>, vector<1x384xf32>
    %57 = vector.broadcast %56 : vector<1x384xf32> to vector<16x384xf32>
    %58 = arith.addf %55, %57 : vector<16x384xf32>
    %cst_24 = arith.constant 0.000000e+00 : f32
    %59 = vector.broadcast %cst_24 : f32 to vector<16x384xf32>
    %60 = arith.maximumf %58, %59 : vector<16x384xf32>
    %c512 = arith.constant 512 : index
    %c0_25 = arith.constant 0 : index
    %61 = vector.load %arg6[%c512, %c0_25] : memref<1024x384xbf16, #tpu.memory_space<vmem>>, vector<512x384xbf16>
    %62 = arith.truncf %52 : vector<16x512xf32> to vector<16x512xbf16>
    %cst_26 = arith.constant dense<0.000000e+00> : vector<16x384xf32>
    %63 = tpu.matmul %62, %61, %cst_26 {dimension_numbers = #tpu.dot_dimension_numbers<[1], [0], [0], [1], [0, 0, 1, 1], [], []>} : vector<16x512xbf16>, vector<512x384xbf16>, vector<16x384xf32> -> vector<16x384xf32>
    %c6 = arith.constant 6 : index
    %c0_27 = arith.constant 0 : index
    %64 = vector.load %arg1[%c6, %c0_27] : memref<32x512xf32, #tpu.memory_space<vmem>>, vector<1x384xf32>
    %65 = vector.broadcast %64 : vector<1x384xf32> to vector<16x384xf32>
    %66 = arith.addf %63, %65 : vector<16x384xf32>
    %cst_28 = arith.constant 0.000000e+00 : f32
    %67 = vector.broadcast %cst_28 : f32 to vector<16x384xf32>
    %68 = arith.maximumf %66, %67 : vector<16x384xf32>
    %c8 = arith.constant 8 : index
    %c0_29 = arith.constant 0 : index
    %69 = vector.load %arg1[%c8, %c0_29] : memref<32x512xf32, #tpu.memory_space<vmem>>, vector<1x384xf32>
    %c9 = arith.constant 9 : index
    %c0_30 = arith.constant 0 : index
    %70 = vector.load %arg1[%c9, %c0_30] : memref<32x512xf32, #tpu.memory_space<vmem>>, vector<1x1xf32>
    %71 = vector.broadcast %69 : vector<1x384xf32> to vector<16x384xf32>
    %72 = arith.mulf %60, %71 : vector<16x384xf32>
    %cst_31 = arith.constant dense<0.000000e+00> : vector<16xf32>
    %73 = vector.multi_reduction <add>, %72, %cst_31 [1] : vector<16x384xf32> to vector<16xf32>
    %74 = vector.shape_cast %73 : vector<16xf32> to vector<16x1xf32>
    %75 = vector.broadcast %70 : vector<1x1xf32> to vector<16x1xf32>
    %76 = arith.addf %74, %75 : vector<16x1xf32>
    %77 = math.tanh %76 : vector<16x1xf32>
    %cst_32 = arith.constant 1.000000e+00 : f32
    %78 = vector.broadcast %cst_32 : f32 to vector<16x1xf32>
    %79 = arith.mulf %78, %77 : vector<16x1xf32>
    %c0_33 = arith.constant 0 : index
    %c0_34 = arith.constant 0 : index
    %80 = vector.load %arg2[%c0_33, %c0_34] : memref<544x64xbf16, #tpu.memory_space<vmem>>, vector<384x64xbf16>
    %81 = arith.truncf %68 : vector<16x384xf32> to vector<16x384xbf16>
    %cst_35 = arith.constant dense<0.000000e+00> : vector<16x64xf32>
    %82 = tpu.matmul %81, %80, %cst_35 {dimension_numbers = #tpu.dot_dimension_numbers<[1], [0], [0], [1], [0, 0, 1, 1], [], []>} : vector<16x384xbf16>, vector<384x64xbf16>, vector<16x64xf32> -> vector<16x64xf32>
    %c7 = arith.constant 7 : index
    %c0_36 = arith.constant 0 : index
    %83 = vector.load %arg1[%c7, %c0_36] : memref<32x512xf32, #tpu.memory_space<vmem>>, vector<1x64xf32>
    %84 = vector.broadcast %83 : vector<1x64xf32> to vector<16x64xf32>
    %85 = arith.addf %82, %84 : vector<16x64xf32>
    %86 = arith.mulf %85, %85 : vector<16x64xf32>
    %cst_37 = arith.constant dense<0.000000e+00> : vector<16xf32>
    %87 = vector.multi_reduction <add>, %86, %cst_37 [1] : vector<16x64xf32> to vector<16xf32>
    %88 = vector.shape_cast %87 : vector<16xf32> to vector<16x1xf32>
    %cst_38 = arith.constant 1.000000e-24 : f32
    %89 = vector.broadcast %cst_38 : f32 to vector<16x1xf32>
    %90 = arith.maximumf %88, %89 : vector<16x1xf32>
    %91 = math.rsqrt %90 : vector<16x1xf32>
    %92 = vector.broadcast %91 : vector<16x1xf32> to vector<16x64xf32>
    %93 = arith.mulf %85, %92 : vector<16x64xf32>
    %94 = vector.shape_cast %79 : vector<16x1xf32> to vector<16x1xf32>
    %95 = vector.broadcast %94 : vector<16x1xf32> to vector<16x64xf32>
    %96 = tpu.concatenate %93, %95 in 1 : vector<16x64xf32>, vector<16x64xf32> -> vector<16x128xf32>
    %c0_39 = arith.constant 0 : index
    %c0_40 = arith.constant 0 : index
    %97 = vector.load %arg5[%c0_39, %c0_40] : memref<16x128xf32, #tpu.memory_space<vmem>>, vector<16x128xf32>
    tpu.vector_store %arg5[%c0_39, %c0_40], %96 {strides = array<i32>} : memref<16x128xf32, #tpu.memory_space<vmem>>, vector<16x128xf32>,
    return
  }
  func.func @transform_0(%arg0: i32) -> (i32, i32) {
    %c0_i32 = arith.constant 0 : i32
    %c0_i32_0 = arith.constant 0 : i32
    %c0_i32_1 = arith.constant 0 : i32
    return %c0_i32, %c0_i32_0 : i32, i32
  }
  func.func @transform_1(%arg0: i32) -> (i32, i32) {
    %c0_i32 = arith.constant 0 : i32
    %c0_i32_0 = arith.constant 0 : i32
    %c0_i32_1 = arith.constant 0 : i32
    return %c0_i32, %c0_i32_0 : i32, i32
  }
  func.func @transform_2(%arg0: i32) -> (i32, i32) {
    %c0_i32 = arith.constant 0 : i32
    %c0_i32_0 = arith.constant 0 : i32
    %c0_i32_1 = arith.constant 0 : i32
    return %c0_i32, %c0_i32_0 : i32, i32
  }
  func.func @transform_4(%arg0: i32) -> (i32, i32) {
    %c0_i32 = arith.constant 0 : i32
    %c0_i32_0 = arith.constant 0 : i32
    %c0_i32_1 = arith.constant 0 : i32
    return %c0_i32, %c0_i32_0 : i32, i32
  }
}

</mosaic_0001>

<bundles_post_ra>
// kernel: actor_graph_policy_forward.1
= control target key start
LH: loop header
LB: loop body
LE: loop exit
PB: predicated region body
PF: predicated region fallthrough
CT: control target
= control target key end

     0   :  { %v3559_v0 = vmov 0.0   ;;  %vm3560_vm0 = vmmov 0   ;;  %vm47_vm1 = vcmask 261120   ;;  %vm94_vm2 = vcmask 523264   ;;  %s4000_s1 = inlined_call_operand.vmem [shape: bf16[544,64], index: 1, kind: input, shape index: {}]   ;;  %s4001_s0 = inlined_call_operand.vmem [shape: f32[32,512], index: 0, kind: input, shape index: {}]   ;;  %s4002_s2 = inlined_call_operand.vmem [shape: bf16[64,1024], index: 2, kind: input, shape index: {}]   ;;  %s4003_s3 = inlined_call_operand.hbm [shape: bf16[1024,384], index: 3, kind: input, shape index: {}]   ;;  %s4004_s4 = inlined_call_operand.vmem [shape: f32[16,128], index: 4, kind: output, shape index: {}]  }
   0x1   :  { %3161 = vmatprep.subr.bf16.mxu0 %v3559_v0  ;;  %v3217_v1 = vld [vmem:[%s4000_s1 + $0xc8] sm:$0xff]   ;;  %3165 = vmatprep.mubr.msk.bf16.mxu0 %vm3560_vm0, %v3559_v0  ;;  %v3218_v2 = vld [vmem:[%s4000_s1 + $0xc0] sm:$0xff]   ;;  %v3221_v19 = vld [vmem:[%s4000_s1 + $0xd8] sm:$0xff]  }
   0x2   :  { %3169 = vmatprep.subr.bf16.mxu1 %v3559_v0  ;;  %3177 = vmatprep.mubr.msk.bf16.mxu1 %vm3560_vm0, %v3559_v0  ;;  %v27_v3 = vld [vmem:[%s4001_s0 + $0x40] sm:$0xff]  ;;  %v3219_v17 = vld [vmem:[%s4000_s1 + $0xe8] sm:$0xff]   ;;  %v3222_v20 = vld [vmem:[%s4000_s1 + $0xd0] sm:$0xff]  }
   0x3   :  { %3162 = vmatpush3.bf16.msra.mxu0 %v3217_v1  ;;  %v28_v4 = vld [vmem:[%s4001_s0 + $0x60] sm:$0xff]  ;;  %3170 = vmatpush3.bf16.msra.mxu1 %v3219_v17  ;;  %v3223_v32 = vld [vmem:[%s4000_s1 + $0x108] sm:$0xff]   ;;  %v3225_v34 = vld [vmem:[%s4000_s1 + $0xf8] sm:$0xff]  }
   0x4   :  { %3163 = vmatprep.subr.bf16.mxu0 %v3559_v0  ;;  %v33_v5 = vpack.c.bf16 %v28_v4, %v27_v3  ;;  %v34_v6 = vld [vmem:[%s4001_s0] ss:$0 sm:$0xff]  ;;  %3171 = vmatprep.subr.bf16.mxu1 %v3559_v0  ;;  %v3226_v35 = vld [vmem:[%s4000_s1 + $0xf0] sm:$0xff]   ;;  %v118_v36 = vld [vmem:[%s4001_s0 + $0x1] ss:$0 sm:$0xff] }
   0x5   :  { %v3220_v18 = vld [vmem:[%s4000_s1 + $0xe0] sm:$0xff]   ;;  %v308_v59 = vld [vmem:[%s4002_s2 + $0xc8] sm:$0xff] }
   0x6   :  { %v3224_v33 = vld [vmem:[%s4000_s1 + $0x100] sm:$0xff]   ;;  %v312_v61 = vld [vmem:[%s4002_s2 + $0xe8] sm:$0xff] }
   0x7   :  { %3164 = vmatpush3.bf16.msra.mxu0 %v3218_v2  ;;  %3172 = vmatpush3.bf16.msra.mxu1 %v3220_v18  ;;  %v198_v46 = vld [vmem:[%s4001_s0 + $0x2] ss:$0 sm:$0xff]  ;;  %v2797_v63 = vcombine.low %v308_v59, %v312_v61  ;;  %v2798_v1 = vcombine.high %v308_v59, %v312_v61  ;;  %v300_v4 = vld [vmem:[%s4002_s2 + $0x88] sm:$0xff]  ;;  %v289_v61 = vld [vmem:[%s4002_s2 + $0x30] sm:$0xff] }
   0x8   :  { %3181 = vmatprep.subr.bf16.mxu0 %v3559_v0  ;;  %3173 = vmatprep.subr.bf16.mxu1 %v3559_v0  ;;  %v307_v57 = vld [vmem:[%s4002_s2 + $0xc0] sm:$0xff] }
   0x9   :  { %v311_v58 = vld [vmem:[%s4002_s2 + $0xe0] sm:$0xff] }
   0xa   :  { %3166 = vmatmul.mubr.msk.bf16.vlgmr.msra.gmra.mxu0 %vm47_vm1, %v33_v5  ;;  %v2796_v60 = vcombine.high %v307_v57, %v311_v58  ;;  %v2795_v62 = vcombine.low %v307_v57, %v311_v58  ;;  %v299_v2 = vld [vmem:[%s4002_s2 + $0x80] sm:$0xff] }
   0xb   :  { %3189 = vmatprep.mubr.msk.bf16.mxu0 %vm3560_vm0, %v3559_v0  ;;  %3174 = vmatpush3.bf16.msra.mxu1 %v3221_v19  ;;  %v303_v3 = vld [vmem:[%s4002_s2 + $0xa0] sm:$0xff]  ;;  %v284_v19 = vld [vmem:[%s4002_s2 + $0x8] sm:$0xff] }
   0xc   :  { %3175 = vmatprep.subr.bf16.mxu1 %v3559_v0  ;;  %3182 = vmatpush3.bf16.msra.mxu0 %v3223_v32  ;;  %v2787_v5 = vcombine.low %v299_v2, %v303_v3  ;;  %v287_v18 = vld [vmem:[%s4002_s2 + $0x20] sm:$0xff] }
   0xd   :  { %3183 = vmatprep.subr.bf16.mxu0 %v3559_v0 }
   0xf   :  { %3176 = vmatpush3.bf16.msra.mxu1 %v3222_v20  ;;  %v288_v20 = vld [vmem:[%s4002_s2 + $0x28] sm:$0xff] }
  0x10   :  { %3184 = vmatpush3.bf16.msra.mxu0 %v3224_v33  ;;  %487 = vmatprep.subr.bf16.mxu1 %v2796_v60  ;;  %v2773_v32 = vcombine.low %v284_v19, %v288_v20  ;;  %v285_v60 = vld [vmem:[%s4002_s2 + $0x10] sm:$0xff] }
  0x11   :  { %3185 = vmatprep.subr.bf16.mxu0 %v3559_v0 }
  0x14   :  { %3186 = vmatpush3.bf16.msra.mxu0 %v3225_v34 }
  0x15   :  { %3187 = vmatprep.subr.bf16.mxu0 %v3559_v0 }
  0x18   :  { %3188 = vmatpush3.bf16.msra.mxu0 %v3226_v35 }
  0x19   :  { %530 = vmatprep.subr.bf16.mxu0 %v2798_v1 }
  0xca   :  { %v85_v7 = vpop.f32.mrf.mxu0 }
  0xcb   :  { %v86_v8 = vadd.f32 %v85_v7, %v34_v6  ;;  %v304_v7 = vld [vmem:[%s4002_s2 + $0xa8] sm:$0xff] }
  0xcc   :  { %v3167_v9 = vpop.f32.mrf.mxu0 }
  0xcd   :  { %v92_v10 = vmul.f32 %v86_v8, %v86_v8  ;;  %v295_v9 = vld [vmem:[%s4002_s2 + $0x60] sm:$0xff] }
  0xce   :  { %v88_v11 = vpop.f32.mrf.mxu0 }
  0xcf   :  { %v89_v12 = vadd.f32 %v88_v11, %v34_v6  ;;  %v95_v13 = vsel %vm94_vm2, %v92_v10, 0.0  ;;  %v2788_v6 = vcombine.high %v299_v2, %v303_v3  ;;  %v3561_v10 = vmov 0  }
  0xd0   :  { %96 = vadd.xlane.f32.xlu0 %v95_v13  ;;  %v3168_v14 = vpop.f32.mrf.mxu0  ;;  %v2789_v11 = vcombine.low %v300_v4, %v304_v7  ;;  %v2776_v3 = vcombine.high %v285_v60, %v289_v61 }
  0xd1   :  { %v93_v15 = vmul.f32 %v89_v12, %v89_v12  ;;  %v292_v14 = vld [vmem:[%s4002_s2 + $0x48] sm:$0xff] }
  0xd3   :  { %v98_v16 = vsel %vm94_vm2, %v93_v15, 0.0  ;;  %v296_v15 = vld [vmem:[%s4002_s2 + $0x68] sm:$0xff] }
  0xd4   :  { %99 = vadd.xlane.f32.xlu0 %v98_v16  ;;  %v283_v16 = vld [vmem:[%s4002_s2] sm:$0xff]  ;;  %v2782_v17 = vcombine.high %v292_v14, %v296_v15 }
 0x159   :  { %v97_v21 = vpop.xlane.xlu0 %96 }
 0x15a   :  { %v101_v22 = vmax.f32 %v97_v21, 1e-24 }
 0x15c   :  { %3227 = vrsqrt.f32 %v101_v22  ;;  %v309_v22 = vld [vmem:[%s4002_s2 + $0xd0] sm:$0xff] }
 0x15d   :  { %v100_v23 = vpop.xlane.xlu0 %99 }
 0x15e   :  { %v102_v24 = vmax.f32 %v100_v23, 1e-24  ;;  %v313_v23 = vld [vmem:[%s4002_s2 + $0xf0] sm:$0xff] }
 0x15f   :  { %v2800_v33 = vcombine.high %v309_v22, %v313_v23 }
 0x160   :  { %3229 = vrsqrt.f32 %v102_v24  ;;  %v310_v24 = vld [vmem:[%s4002_s2 + $0xd8] sm:$0xff] }
 0x169   :  { %v3228_v25 = vpop.eup %3227 }
 0x16a   :  { %v105_v26 = vmul.f32 %v3228_v25, %v86_v8  ;;  %v291_v8 = vld [vmem:[%s4002_s2 + $0x40] sm:$0xff]  ;;  %v2781_v25 = vcombine.low %v292_v14, %v296_v15 }
 0x16b   :  { %v2780_v13 = vcombine.high %v291_v8, %v295_v9  ;;  %v2779_v21 = vcombine.low %v291_v8, %v295_v9 }
 0x16c   :  { %3231 = vtanh.f32 %v105_v26  ;;  %v2772_v26 = vcombine.high %v283_v16, %v287_v18 }
 0x16d   :  { %v3230_v27 = vpop.eup %3229 }
 0x16e   :  { %v106_v28 = vmul.f32 %v3230_v27, %v89_v12  ;;  %v2790_v12 = vcombine.high %v300_v4, %v304_v7  ;;  %v2799_v27 = vcombine.low %v309_v22, %v313_v23 }
 0x170   :  { %3233 = vtanh.f32 %v106_v28  ;;  %v314_v28 = vld [vmem:[%s4002_s2 + $0xf8] sm:$0xff] }
 0x171   :  { %v2802_v34 = vcombine.high %v310_v24, %v314_v28 }
 0x179   :  { %v3232_v29 = vpop.eup %3231 }
 0x17d   :  { %v3234_v30 = vpop.eup %3233 }
 0x17e   :  { %v117_v31 = vpack.c.bf16 %v3234_v30, %v3232_v29  ;;  %v2774_v29 = vcombine.high %v284_v19, %v288_v20  ;;  %v2801_v30 = vcombine.low %v310_v24, %v314_v28 }
 0x180   :  { %3178 = vmatmul.mubr.msk.bf16.vlgmr.msra.gmra.mxu1 %vm94_vm2, %v117_v31  ;;  %v2771_v31 = vcombine.low %v283_v16, %v287_v18 }
 0x181   :  { %488 = vmatpush1.bf16.msra.mxu1 %v2795_v62  ;;  %511 = vmatprep.mubr.bf16.mxu1 %v3561_v10  ;;  %v286_v62 = vld [vmem:[%s4002_s2 + $0x18] sm:$0xff] }
 0x182   :  { %489 = vmatprep.subr.bf16.mxu1 %v2788_v6 }
 0x185   :  { %490 = vmatpush1.bf16.msra.mxu1 %v2787_v5  ;;  %v2775_v5 = vcombine.low %v285_v60, %v289_v61 }
 0x186   :  { %491 = vmatprep.subr.bf16.mxu1 %v2780_v13 }
 0x189   :  { %492 = vmatpush1.bf16.msra.mxu1 %v2779_v21 }
 0x18a   :  { %493 = vmatprep.subr.bf16.mxu1 %v2772_v26 }
 0x18d   :  { %494 = vmatpush1.bf16.msra.mxu1 %v2771_v31 }
 0x18e   :  { %573 = vmatprep.subr.bf16.mxu1 %v2800_v33 }
 0x240   :  { %v180_v37 = vpop.f32.mrf.mxu1 }
 0x241   :  { %v181_v38 = vadd.f32 %v180_v37, %v118_v36 }
 0x242   :  { %v3179_v39 = vpop.f32.mrf.mxu1 }
 0x243   :  { %3235 = vtanh.f32 %v181_v38 }
 0x244   :  { %v183_v40 = vpop.f32.mrf.mxu1 }
 0x245   :  { %v184_v41 = vadd.f32 %v183_v40, %v118_v36 }
 0x246   :  { %v3180_v42 = vpop.f32.mrf.mxu1 }
 0x247   :  { %3237 = vtanh.f32 %v184_v41 }
 0x250   :  { %v3236_v43 = vpop.eup %3235 }
 0x254   :  { %v3238_v44 = vpop.eup %3237 }
 0x255   :  { %v197_v45 = vpack.c.bf16 %v3238_v44, %v3236_v43  ;;  %v301_v43 = vld [vmem:[%s4002_s2 + $0x90] sm:$0xff] }
 0x256   :  { %v305_v44 = vld [vmem:[%s4002_s2 + $0xb0] sm:$0xff] }
 0x257   :  { %3190 = vmatmul.mubr.msk.bf16.vlgmr.msra.gmra.mxu0 %vm94_vm2, %v197_v45  ;;  %v302_v45 = vld [vmem:[%s4002_s2 + $0x98] sm:$0xff] }
 0x258   :  { %531 = vmatpush1.bf16.msra.mxu0 %v2797_v63  ;;  %554 = vmatprep.mubr.bf16.mxu0 %v3561_v10  ;;  %v290_v63 = vld [vmem:[%s4002_s2 + $0x38] sm:$0xff] }
 0x259   :  { %532 = vmatprep.subr.bf16.mxu0 %v2790_v12  ;;  %v2778_v4 = vcombine.high %v286_v62, %v290_v63  ;;  %v2777_v6 = vcombine.low %v286_v62, %v290_v63 }
 0x25c   :  { %533 = vmatpush1.bf16.msra.mxu0 %v2789_v11 }
 0x25d   :  { %534 = vmatprep.subr.bf16.mxu0 %v2782_v17 }
 0x260   :  { %535 = vmatpush1.bf16.msra.mxu0 %v2781_v25 }
 0x261   :  { %536 = vmatprep.subr.bf16.mxu0 %v2774_v29 }
 0x264   :  { %537 = vmatpush1.bf16.msra.mxu0 %v2773_v32 }
 0x265   :  { %616 = vmatprep.subr.bf16.mxu0 %v2802_v34 }
 0x317   :  { %v260_v47 = vpop.f32.mrf.mxu0 }
 0x318   :  { %v3653_v48 = vadd.f32 %v260_v47, %v198_v46 }
 0x319   :  { %v3191_v49 = vpop.f32.mrf.mxu0 }
 0x31a   :  { %v267_v50 = vmul.f32 %v3653_v48, %v3653_v48 }
 0x31b   :  { %v263_v51 = vpop.f32.mrf.mxu0 }
 0x31c   :  { %v3657_v52 = vadd.f32 %v263_v51, %v198_v46  ;;  %v269_v53 = vsel %vm94_vm2, %v267_v50, 0.0  ;;  %v306_v46 = vld [vmem:[%s4002_s2 + $0xb8] sm:$0xff]  ;;  %v2792_v50 = vcombine.high %v301_v43, %v305_v44 }
 0x31d   :  { %270 = vadd.xlane.f32.xlu1 %v269_v53  ;;  %v3192_v54 = vpop.f32.mrf.mxu0  ;;  %v2794_v51 = vcombine.high %v302_v45, %v306_v46  ;;  %v297_v53 = vld [vmem:[%s4002_s2 + $0x70] sm:$0xff]  ;;  %v2793_v57 = vcombine.low %v302_v45, %v306_v46 }
 0x31e   :  { %v268_v55 = vmul.f32 %v3657_v52, %v3657_v52  ;;  %v294_v54 = vld [vmem:[%s4002_s2 + $0x58] sm:$0xff] }
 0x320   :  { %v272_v56 = vsel %vm94_vm2, %v268_v55, 0.0  ;;  %v298_v55 = vld [vmem:[%s4002_s2 + $0x78] sm:$0xff] }
 0x321   :  { %273 = vadd.xlane.f32.xlu1 %v272_v56  ;;  %v2791_v56 = vcombine.low %v301_v43, %v305_v44  ;;  %v2786_v59 = vcombine.high %v294_v54, %v298_v55  ;;  %v2785_v2 = vcombine.low %v294_v54, %v298_v55 }
 0x3a6   :  { %v271_v35 = vpop.xlane.xlu1 %270 }
 0x3a7   :  { %v275_v36 = vmax.f32 %v271_v35, 1e-24 }
 0x3a9   :  { %3239 = vrsqrt.f32 %v275_v36 }
 0x3aa   :  { %v274_v37 = vpop.xlane.xlu1 %273 }
 0x3ab   :  { %v276_v38 = vmax.f32 %v274_v37, 1e-24 }
 0x3ad   :  { %3241 = vrsqrt.f32 %v276_v38 }
 0x3b6   :  { %v3240_v39 = vpop.eup %3239 }
 0x3b7   :  { %v279_v40 = vmul.f32 %v3240_v39, %v3653_v48 }
 0x3b9   :  { %3243 = vtanh.f32 %v279_v40 }
 0x3ba   :  { %v3242_v41 = vpop.eup %3241 }
 0x3bb   :  { %v280_v42 = vmul.f32 %v3242_v41, %v3657_v52  ;;  %v293_v52 = vld [vmem:[%s4002_s2 + $0x50] sm:$0xff]  ;;  %s3562_s2 = smov [#allocation2]  }
 0x3bc   :  { %v2784_v58 = vcombine.high %v293_v52, %v297_v53  ;;  %v2783_v1 = vcombine.low %v293_v52, %v297_v53  ;;  %s23_s5 = sshll.u32 %s3562_s2, 4  ;;  %s24_s5 = int_to_ptr.vmem [resolvable:$true] %s23_s5 }
 0x3bd   :  { %3245 = vtanh.f32 %v280_v42  ;;  %s3545_s6 = scalar_lea.vmem %s24_s5, 24576  ;;  %p3550_p1 = scmp.lt.s32.totalorder %s24_s5, %s24_s5 }
 0x3be   :  { %p3546_p0 = scmp.ne.s32.totalorder %s24_s5, %s3545_s6  ;;  %p3551_p2 = scmp.lt.s32.totalorder %s3545_s6, %s3545_s6 }
 0x3c0   :  { %p3552_p3 = por %p3551_p2, %p3550_p1 }
 0x3c2   :  { %p3553_p4 = pnand %p3552_p3, %p3546_p0 }
 0x3c6   :  { %v3244_v47 = vpop.eup %3243 }
 0x3ca   :  { %v3246_v48 = vpop.eup %3245 }
 0x3cb   :  { %v315_v49 = vpack.c.bf16 %v3246_v48, %v3244_v47 }
 0x3cd   :  { %2803 = vmatmul.mubr.msk.bf16.vlgmr.msra.gmra.mxu1 %vm94_vm2, %v315_v49  ;;  %2804 = vmatmul.mubr.msk.bf16.vlgmr.msra.gmra.mxu0 %vm94_vm2, %v315_v49 }
 0x3ce   :  { %574 = vmatpush1.bf16.msra.mxu1 %v2799_v27  ;;  %617 = vmatpush1.bf16.msra.mxu0 %v2801_v30 }
 0x3cf   :  { %575 = vmatprep.subr.bf16.mxu1 %v2792_v50  ;;  %618 = vmatprep.subr.bf16.mxu0 %v2794_v51 }
 0x3d0   :  { %597 = vmatprep.mubr.bf16.mxu1 %v3561_v10  ;;  %640 = vmatprep.mubr.bf16.mxu0 %v3561_v10 }
 0x3d2   :  { %576 = vmatpush1.bf16.msra.mxu1 %v2791_v56  ;;  %619 = vmatpush1.bf16.msra.mxu0 %v2793_v57 }
 0x3d3   :  { %577 = vmatprep.subr.bf16.mxu1 %v2784_v58  ;;  %620 = vmatprep.subr.bf16.mxu0 %v2786_v59 }
 0x3d6   :  { %578 = vmatpush1.bf16.msra.mxu1 %v2783_v1  ;;  %621 = vmatpush1.bf16.msra.mxu0 %v2785_v2 }
 0x3d7   :  { %579 = vmatprep.subr.bf16.mxu1 %v2776_v3  ;;  %622 = vmatprep.subr.bf16.mxu0 %v2778_v4 }
 0x3da   :  { %580 = vmatpush1.bf16.msra.mxu1 %v2775_v5  ;;  %623 = vmatpush1.bf16.msra.mxu0 %v2777_v6 }
 0x3dd   :  { %2805 = vmatmul.mubr.msk.bf16.vlgmr.msra.gmra.mxu1 %vm94_vm2, %v315_v49  ;;  %2806 = vmatmul.mubr.msk.bf16.vlgmr.msra.gmra.mxu0 %vm94_vm2, %v315_v49 }
 0x3de   :  { %3556 = shalt.err (!%p3553_p4)  }
 0x3df   :  { %26 = dma.hbm_to_vmem [thread:$0]  %s4003_s3, 24576, %s24_s5, [#allocation3]  ;;  %v654_v7 = vlaneseq  ;;  %v2807_v12 = vld [vmem:[%s4001_s0 + $0x3] ss:$8 sm:$0xf] }
 0x3e0   :  { %v2808_v43 = vld [vmem:[%s4001_s0 + $0x4] ss:$8 sm:$0xf] }
 0x3e1   :  { %v655_v8 = vshrl.u32 %v654_v7, 7 }
 0x3e3   :  { %v3772_v9 = vsub.s32 0, %v655_v8  ;;  %v3774_v11 = vsub.s32 2, %v655_v8  ;;  %v3779_v13 = vsub.s32 1, %v655_v8  ;;  %v668_v14 = vsub.s32 3, %v655_v8 }
 0x3e5   :  { %v657_v15 = vrot.slane %v2807_v12, %v3772_v9  ;;  %v665_v16 = vrot.slane %v2807_v12, %v3774_v11  ;;  %v661_v17 = vrot.slane %v2807_v12, %v3779_v13  ;;  %v669_v18 = vrot.slane %v2807_v12, %v668_v14 }
 0x3e6   :  { %v696_v44 = vrot.slane %v2808_v43, %v3772_v9  ;;  %v704_v45 = vrot.slane %v2808_v43, %v3774_v11  ;;  %v700_v46 = vrot.slane %v2808_v43, %v3779_v13  ;;  %v708_v47 = vrot.slane %v2808_v43, %v668_v14 }
 0x48d   :  { %v513_v19 = vpop.f32.mrf.mxu1  ;;  %v556_v20 = vpop.f32.mrf.mxu0 }
 0x48e   :  { %v3784_v21 = vadd.f32 %v657_v15, %v513_v19  ;;  %v3786_v22 = vadd.f32 %v665_v16, %v556_v20 }
 0x48f   :  { %v515_v23 = vpop.f32.mrf.mxu1  ;;  %v558_v24 = vpop.f32.mrf.mxu0 }
 0x490   :  { %v682_v25 = vmax.f32 %v3784_v21, 0.0  ;;  %v684_v26 = vmax.f32 %v3786_v22, 0.0  ;;  %v675_v27 = vadd.f32 %v661_v17, %v515_v23  ;;  %v677_v28 = vadd.f32 %v669_v18, %v558_v24 }
 0x491   :  { %v517_v29 = vpop.f32.mrf.mxu1  ;;  %v560_v30 = vpop.f32.mrf.mxu0 }
 0x492   :  { %v683_v31 = vmax.f32 %v675_v27, 0.0  ;;  %v685_v32 = vmax.f32 %v677_v28, 0.0  ;;  %v3790_v33 = vadd.f32 %v657_v15, %v517_v29  ;;  %v3792_v34 = vadd.f32 %v665_v16, %v560_v30 }
 0x493   :  { %v519_v35 = vpop.f32.mrf.mxu1  ;;  %v562_v36 = vpop.f32.mrf.mxu0 }
 0x494   :  { %v686_v37 = vmax.f32 %v3790_v33, 0.0  ;;  %v688_v38 = vmax.f32 %v3792_v34, 0.0  ;;  %v679_v39 = vadd.f32 %v661_v17, %v519_v35  ;;  %v681_v40 = vadd.f32 %v669_v18, %v562_v36 }
 0x496   :  { %v687_v41 = vmax.f32 %v679_v39, 0.0  ;;  %v689_v42 = vmax.f32 %v681_v40, 0.0 }
 0x49d   :  { %v599_v48 = vpop.f32.mrf.mxu1  ;;  %v642_v49 = vpop.f32.mrf.mxu0 }
 0x49e   :  { %v3802_v50 = vadd.f32 %v696_v44, %v599_v48  ;;  %v3804_v51 = vadd.f32 %v704_v45, %v642_v49 }
 0x49f   :  { %v601_v52 = vpop.f32.mrf.mxu1  ;;  %v644_v53 = vpop.f32.mrf.mxu0 }
 0x4a0   :  { %v721_v54 = vmax.f32 %v3802_v50, 0.0  ;;  %v723_v55 = vmax.f32 %v3804_v51, 0.0  ;;  %v3808_v56 = vadd.f32 %v700_v46, %v601_v52  ;;  %v3810_v57 = vadd.f32 %v708_v47, %v644_v53 }
 0x4a1   :  { %v603_v58 = vpop.f32.mrf.mxu1  ;;  %v646_v59 = vpop.f32.mrf.mxu0 }
 0x4a2   :  { %v722_v60 = vmax.f32 %v3808_v56, 0.0  ;;  %v724_v61 = vmax.f32 %v3810_v57, 0.0  ;;  %v3814_v62 = vadd.f32 %v696_v44, %v603_v58  ;;  %v3816_v63 = vadd.f32 %v704_v45, %v646_v59 }
 0x4a3   :  { %v605_v1 = vpop.f32.mrf.mxu1  ;;  %v648_v2 = vpop.f32.mrf.mxu0 }
 0x4a4   :  { %v725_v3 = vmax.f32 %v3814_v62, 0.0  ;;  %v727_v4 = vmax.f32 %v3816_v63, 0.0  ;;  %v3820_v5 = vadd.f32 %v700_v46, %v605_v1  ;;  %v3822_v6 = vadd.f32 %v708_v47, %v648_v2 }
 0x4a6   :  { %v726_v7 = vmax.f32 %v3820_v5, 0.0  ;;  %v728_v8 = vmax.f32 %v3822_v6, 0.0 }
 0x4a7   :  { %3557 = dma.done.wait [#allocation3], 24576 }
 0x4a8   :  { %3558 = vsyncadd [#allocation3], 4294942720  ;;  %v3826_v12 = vpack.c.bf16 %v687_v41, %v683_v31  ;;  %v3828_v14 = vpack.c.bf16 %v689_v42, %v685_v32  ;;  %3247 = vset.pattern.permute.xlu0 %v3561_v10  ;;  %3248 = vset.pattern.permute.xlu1 %v3561_v10  ;;  %v3249_v15 = vld [vmem:[#allocation2 + $0xac] ss:$12 sps:$4 sm:$0xff]   ;;  %v3253_v17 = vld [vmem:[#allocation2 + $0xa8] ss:$12 sps:$4 sm:$0xff]  }
 0x4a9   :  { %v3251_v16 = vld [vmem:[#allocation2 + $0x22c] ss:$12 sps:$4 sm:$0xff]   ;;  %1395 = vmatprep.subr.bf16.mxu1 %v3249_v15  ;;  %v3254_v18 = vld [vmem:[#allocation2 + $0x228] ss:$12 sps:$4 sm:$0xff]   ;;  %v3259_v23 = vld [vmem:[#allocation2 + $0x90] ss:$12 sps:$4 sm:$0xff]  }
 0x4aa   :  { %1427 = vmatprep.mubr.bf16.mxu1 %v3826_v12  ;;  %1470 = vmatprep.mubr.bf16.mxu0 %v3828_v14  ;;  %v3255_v19 = vld [vmem:[#allocation2 + $0x94] ss:$12 sps:$4 sm:$0xff]   ;;  %v3260_v24 = vld [vmem:[#allocation2 + $0x210] ss:$12 sps:$4 sm:$0xff]   ;;  %v3265_v28 = vld [vmem:[#allocation2 + $0x78] ss:$12 sps:$4 sm:$0xff]  }
 0x4ab   :  { %1438 = vmatprep.subr.bf16.mxu0 %v3251_v16  ;;  %1396 = vmatpush1.bf16.msra.mxu1 %v3253_v17  ;;  %v3257_v20 = vld [vmem:[#allocation2 + $0x214] ss:$12 sps:$4 sm:$0xff]   ;;  %v3261_v27 = vld [vmem:[#allocation2 + $0x7c] ss:$12 sps:$4 sm:$0xff]   ;;  %v3266_v29 = vld [vmem:[#allocation2 + $0x1f8] ss:$12 sps:$4 sm:$0xff]  }
 0x4ac   :  { %1439 = vmatpush1.bf16.msra.mxu0 %v3254_v18  ;;  %1397 = vmatprep.subr.bf16.mxu1 %v3255_v19  ;;  %v3263_v10 = vld [vmem:[#allocation2 + $0x1fc] ss:$12 sps:$4 sm:$0xff]   ;;  %v3267_v30 = vld [vmem:[#allocation2 + $0x64] ss:$12 sps:$4 sm:$0xff]   ;;  %v3271_v32 = vld [vmem:[#allocation2 + $0x60] ss:$12 sps:$4 sm:$0xff]  }
 0x4ad   :  { %1440 = vmatprep.subr.bf16.mxu0 %v3257_v20  ;;  %v3269_v31 = vld [vmem:[#allocation2 + $0x1e4] ss:$12 sps:$4 sm:$0xff]   ;;  %v3272_v35 = vld [vmem:[#allocation2 + $0x1e0] ss:$12 sps:$4 sm:$0xff]   ;;  %v3277_v40 = vld [vmem:[#allocation2 + $0x48] ss:$12 sps:$4 sm:$0xff]  }
 0x4ae   :  { %v3273_v36 = vld [vmem:[#allocation2 + $0x4c] ss:$12 sps:$4 sm:$0xff]   ;;  %v3278_v41 = vld [vmem:[#allocation2 + $0x1c8] ss:$12 sps:$4 sm:$0xff]   ;;  %v3283_v44 = vld [vmem:[#allocation2 + $0x30] ss:$12 sps:$4 sm:$0xff]  }
 0x4af   :  { %1398 = vmatpush1.bf16.msra.mxu1 %v3259_v23  ;;  %v3275_v39 = vld [vmem:[#allocation2 + $0x1cc] ss:$12 sps:$4 sm:$0xff]   ;;  %v3279_v42 = vld [vmem:[#allocation2 + $0x34] ss:$12 sps:$4 sm:$0xff]   ;;  %v3284_v45 = vld [vmem:[#allocation2 + $0x1b0] ss:$12 sps:$4 sm:$0xff]  }
 0x4b0   :  { %1441 = vmatpush1.bf16.msra.mxu0 %v3260_v24  ;;  %1399 = vmatprep.subr.bf16.mxu1 %v3261_v27  ;;  %v3281_v43 = vld [vmem:[#allocation2 + $0x1b4] ss:$12 sps:$4 sm:$0xff]   ;;  %v3285_v46 = vld [vmem:[#allocation2 + $0x1c] ss:$12 sps:$4 sm:$0xff]   ;;  %v3289_v48 = vld [vmem:[#allocation2 + $0x18] ss:$12 sps:$4 sm:$0xff]  }
 0x4b1   :  { %1442 = vmatprep.subr.bf16.mxu0 %v3263_v10  ;;  %v3287_v47 = vld [vmem:[#allocation2 + $0x19c] ss:$12 sps:$4 sm:$0xff]   ;;  %v3290_v49 = vld [vmem:[#allocation2 + $0x198] ss:$12 sps:$4 sm:$0xff]   ;;  %v3295_v58 = vld [vmem:[#allocation2] ss:$12 sps:$4 sm:$0xff]  }
 0x4b2   :  { %v3291_v52 = vld [vmem:[#allocation2 + $0x4] ss:$12 sps:$4 sm:$0xff]   ;;  %v3296_v59 = vld [vmem:[#allocation2 + $0x180] ss:$12 sps:$4 sm:$0xff]   ;;  %v3301_v15 = vld [vmem:[#allocation2 + $0x168] ss:$12 sps:$4 sm:$0xff]  }
 0x4b3   :  { %1400 = vmatpush1.bf16.msra.mxu1 %v3265_v28  ;;  %v3293_v53 = vld [vmem:[#allocation2 + $0x184] ss:$12 sps:$4 sm:$0xff]   ;;  %v3297_v1 = vld [vmem:[#allocation2 + $0x16c] ss:$12 sps:$4 sm:$0xff]   ;;  %v3302_v16 = vld [vmem:[#allocation2 + $0x2e8] ss:$12 sps:$4 sm:$0xff]  }
 0x4b4   :  { %1443 = vmatpush1.bf16.msra.mxu0 %v3266_v29  ;;  %1401 = vmatprep.subr.bf16.mxu1 %v3267_v30  ;;  %v3299_v2 = vld [vmem:[#allocation2 + $0x2ec] ss:$12 sps:$4 sm:$0xff]   ;;  %v3303_v17 = vld [vmem:[#allocation2 + $0x154] ss:$12 sps:$4 sm:$0xff]   ;;  %v3307_v19 = vld [vmem:[#allocation2 + $0x150] ss:$12 sps:$4 sm:$0xff]  }
 0x4b5   :  { %1444 = vmatprep.subr.bf16.mxu0 %v3269_v31  ;;  %v3305_v18 = vld [vmem:[#allocation2 + $0x2d4] ss:$12 sps:$4 sm:$0xff]   ;;  %v3308_v20 = vld [vmem:[#allocation2 + $0x2d0] ss:$12 sps:$4 sm:$0xff]   ;;  %v3313_v27 = vld [vmem:[#allocation2 + $0x138] ss:$12 sps:$4 sm:$0xff]  }
 0x4b6   :  { %v3309_v23 = vld [vmem:[#allocation2 + $0x13c] ss:$12 sps:$4 sm:$0xff]   ;;  %v3314_v10 = vld [vmem:[#allocation2 + $0x2b8] ss:$12 sps:$4 sm:$0xff]   ;;  %v3319_v30 = vld [vmem:[#allocation2 + $0x120] ss:$12 sps:$4 sm:$0xff]  }
 0x4b7   :  { %1402 = vmatpush1.bf16.msra.mxu1 %v3271_v32  ;;  %v3311_v24 = vld [vmem:[#allocation2 + $0x2bc] ss:$12 sps:$4 sm:$0xff]   ;;  %v3315_v28 = vld [vmem:[#allocation2 + $0x124] ss:$12 sps:$4 sm:$0xff]   ;;  %v3320_v31 = vld [vmem:[#allocation2 + $0x2a0] ss:$12 sps:$4 sm:$0xff]  }
 0x4b8   :  { %1445 = vmatpush1.bf16.msra.mxu0 %v3272_v35  ;;  %1403 = vmatprep.subr.bf16.mxu1 %v3273_v36  ;;  %v3317_v29 = vld [vmem:[#allocation2 + $0x2a4] ss:$12 sps:$4 sm:$0xff]   ;;  %v3321_v32 = vld [vmem:[#allocation2 + $0x10c] ss:$12 sps:$4 sm:$0xff]   ;;  %v3325_v36 = vld [vmem:[#allocation2 + $0x108] ss:$12 sps:$4 sm:$0xff]  }
 0x4b9   :  { %1446 = vmatprep.subr.bf16.mxu0 %v3275_v39  ;;  %v3323_v35 = vld [vmem:[#allocation2 + $0x28c] ss:$12 sps:$4 sm:$0xff]   ;;  %v3326_v39 = vld [vmem:[#allocation2 + $0x288] ss:$12 sps:$4 sm:$0xff]   ;;  %v3400_v5 = vld [vmem:[#allocation2 + $0x4e4] ss:$12 sps:$4 sm:$0xff]  }
 0x4ba   :  { %v3352_v21 = vld [vmem:[#allocation2 + $0x218] ss:$12 sps:$4 sm:$0xff]   ;;  %v3353_v22 = vld [vmem:[#allocation2 + $0x140] ss:$12 sps:$4 sm:$0xff]   ;;  %v3357_v34 = vld [vmem:[#allocation2 + $0x128] ss:$12 sps:$4 sm:$0xff]  }
 0x4bb   :  { %1404 = vmatpush1.bf16.msra.mxu1 %v3277_v40  ;;  %v3327_v40 = vld [vmem:[#allocation2 + $0xf4] ss:$12 sps:$4 sm:$0xff]   ;;  %v3394_v56 = vld [vmem:[#allocation2 + $0x4fc] ss:$12 sps:$4 sm:$0xff]   ;;  %v3389_v57 = vld [vmem:[#allocation2 + $0x378] ss:$12 sps:$4 sm:$0xff]  }
 0x4bc   :  { %1447 = vmatpush1.bf16.msra.mxu0 %v3278_v41  ;;  %1405 = vmatprep.subr.bf16.mxu1 %v3279_v42  ;;  %v3329_v41 = vld [vmem:[#allocation2 + $0x274] ss:$12 sps:$4 sm:$0xff]   ;;  %v3331_v42 = vld [vmem:[#allocation2 + $0xf0] ss:$12 sps:$4 sm:$0xff]  }
 0x4bd   :  { %1448 = vmatprep.subr.bf16.mxu0 %v3281_v43  ;;  %v3332_v43 = vld [vmem:[#allocation2 + $0x270] ss:$12 sps:$4 sm:$0xff]   ;;  %v3356_v33 = vld [vmem:[#allocation2 + $0x200] ss:$12 sps:$4 sm:$0xff]   ;;  %v3485_v62 = vld [vmem:[#allocation2 + $0x428] ss:$12 sps:$4 sm:$0xff]  }
 0x4be   :  { %v3395_v6 = vld [vmem:[#allocation2 + $0x360] ss:$12 sps:$4 sm:$0xff]   ;;  %v3486_v63 = vld [vmem:[#allocation2 + $0x5a8] ss:$12 sps:$4 sm:$0xff]  }
 0x4bf   :  { %1406 = vmatpush1.bf16.msra.mxu1 %v3283_v44  ;;  %v3333_v44 = vld [vmem:[#allocation2 + $0xdc] ss:$12 sps:$4 sm:$0xff]   ;;  %v3481_v50 = vld [vmem:[#allocation2 + $0x440] ss:$12 sps:$4 sm:$0xff]  }
 0x4c0   :  { %1449 = vmatpush1.bf16.msra.mxu0 %v3284_v45  ;;  %1407 = vmatprep.subr.bf16.mxu1 %v3285_v46  ;;  %v3335_v45 = vld [vmem:[#allocation2 + $0x25c] ss:$12 sps:$4 sm:$0xff]   ;;  %v3337_v46 = vld [vmem:[#allocation2 + $0xd8] ss:$12 sps:$4 sm:$0xff]   ;;  %v3483_v51 = vld [vmem:[#allocation2 + $0x380] ss:$12 sps:$4 sm:$0xff]  }
 0x4c1   :  { %1450 = vmatprep.subr.bf16.mxu0 %v3287_v47  ;;  %v3338_v47 = vld [vmem:[#allocation2 + $0x258] ss:$12 sps:$4 sm:$0xff]  }
 0x4c3   :  { %1408 = vmatpush1.bf16.msra.mxu1 %v3289_v48  ;;  %v3339_v48 = vld [vmem:[#allocation2 + $0xc4] ss:$12 sps:$4 sm:$0xff]  }
 0x4c4   :  { %1451 = vmatpush1.bf16.msra.mxu0 %v3290_v49  ;;  %1409 = vmatprep.subr.bf16.mxu1 %v3291_v52  ;;  %v3341_v49 = vld [vmem:[#allocation2 + $0x244] ss:$12 sps:$4 sm:$0xff]   ;;  %v3343_v52 = vld [vmem:[#allocation2 + $0xc0] ss:$12 sps:$4 sm:$0xff]  }
 0x4c5   :  { %1452 = vmatprep.subr.bf16.mxu0 %v3293_v53  ;;  %v3344_v53 = vld [vmem:[#allocation2 + $0x240] ss:$12 sps:$4 sm:$0xff]  }
 0x4c7   :  { %1410 = vmatpush1.bf16.msra.mxu1 %v3295_v58  ;;  %v3345_v58 = vld [vmem:[#allocation2 + $0x170] ss:$12 sps:$4 sm:$0xff]  }
 0x4c8   :  { %1453 = vmatpush1.bf16.msra.mxu0 %v3296_v59  ;;  %1411 = vmatprep.subr.bf16.mxu1 %v3297_v1  ;;  %v3346_v59 = vld [vmem:[#allocation2 + $0x2f0] ss:$12 sps:$4 sm:$0xff]  }
 0x4c9   :  { %1454 = vmatprep.subr.bf16.mxu0 %v3299_v2  ;;  %v3347_v1 = vld [vmem:[#allocation2 + $0xb0] ss:$12 sps:$4 sm:$0xff]   ;;  %v3838_v2 = vpack.c.bf16 %v686_v37, %v682_v25  ;;  %v3354_v25 = vld [vmem:[#allocation2 + $0x2c0] ss:$12 sps:$4 sm:$0xff]   ;;  %v3358_v37 = vld [vmem:[#allocation2 + $0x2a8] ss:$12 sps:$4 sm:$0xff]  }
 0x4cb   :  { %1412 = vmatpush2.bf16.msra.mxu1 %v3301_v15  ;;  %v3844_v15 = vpack.c.bf16 %v688_v38, %v684_v26  ;;  %v3355_v26 = vld [vmem:[#allocation2 + $0x80] ss:$12 sps:$4 sm:$0xff]   ;;  %v3359_v38 = vld [vmem:[#allocation2 + $0x68] ss:$12 sps:$4 sm:$0xff]  }
 0x4cc   :  { %1455 = vmatpush2.bf16.msra.mxu0 %v3302_v16  ;;  %1413 = vmatprep.subr.bf16.mxu1 %v3303_v17  ;;  %v3348_v16 = vld [vmem:[#allocation2 + $0x230] ss:$12 sps:$4 sm:$0xff]   ;;  %v3349_v17 = vld [vmem:[#allocation2 + $0x158] ss:$12 sps:$4 sm:$0xff]  }
 0x4cd   :  { %1456 = vmatprep.subr.bf16.mxu0 %v3305_v18  ;;  %v3350_v18 = vld [vmem:[#allocation2 + $0x2d8] ss:$12 sps:$4 sm:$0xff]  }
 0x4cf   :  { %1414 = vmatpush2.bf16.msra.mxu1 %v3307_v19  ;;  %v3351_v19 = vld [vmem:[#allocation2 + $0x98] ss:$12 sps:$4 sm:$0xff]  }
 0x4d0   :  { %1457 = vmatpush2.bf16.msra.mxu0 %v3308_v20  ;;  %1415 = vmatprep.subr.bf16.mxu1 %v3309_v23  ;;  %v3360_v20 = vld [vmem:[#allocation2 + $0x1e8] ss:$12 sps:$4 sm:$0xff]   ;;  %v3361_v23 = vld [vmem:[#allocation2 + $0x110] ss:$12 sps:$4 sm:$0xff]  }
 0x4d1   :  { %1458 = vmatprep.subr.bf16.mxu0 %v3311_v24  ;;  %v3362_v24 = vld [vmem:[#allocation2 + $0x290] ss:$12 sps:$4 sm:$0xff]  }
 0x4d3   :  { %1416 = vmatpush2.bf16.msra.mxu1 %v3313_v27  ;;  %v3363_v27 = vld [vmem:[#allocation2 + $0x50] ss:$12 sps:$4 sm:$0xff]  }
 0x4d4   :  { %1459 = vmatpush2.bf16.msra.mxu0 %v3314_v10  ;;  %1417 = vmatprep.subr.bf16.mxu1 %v3315_v28  ;;  %v3364_v10 = vld [vmem:[#allocation2 + $0x1d0] ss:$12 sps:$4 sm:$0xff]   ;;  %v3367_v28 = vld [vmem:[#allocation2 + $0x38] ss:$12 sps:$4 sm:$0xff]  }
 0x4d5   :  { %1460 = vmatprep.subr.bf16.mxu0 %v3317_v29  ;;  %v3368_v29 = vld [vmem:[#allocation2 + $0x1b8] ss:$12 sps:$4 sm:$0xff]  }
 0x4d7   :  { %1418 = vmatpush2.bf16.msra.mxu1 %v3319_v30  ;;  %v3369_v30 = vld [vmem:[#allocation2 + $0xe0] ss:$12 sps:$4 sm:$0xff]  }
 0x4d8   :  { %1461 = vmatpush2.bf16.msra.mxu0 %v3320_v31  ;;  %1419 = vmatprep.subr.bf16.mxu1 %v3321_v32  ;;  %v3370_v31 = vld [vmem:[#allocation2 + $0x260] ss:$12 sps:$4 sm:$0xff]  }
 0x4d9   :  { %1462 = vmatprep.subr.bf16.mxu0 %v3323_v35  ;;  %v3371_v32 = vld [vmem:[#allocation2 + $0x20] ss:$12 sps:$4 sm:$0xff]  }
 0x4da   :  { %v3372_v35 = vld [vmem:[#allocation2 + $0x1a0] ss:$12 sps:$4 sm:$0xff]  }
 0x4db   :  { %1420 = vmatpush2.bf16.msra.mxu1 %v3325_v36  ;;  %v3373_v36 = vld [vmem:[#allocation2 + $0xc8] ss:$12 sps:$4 sm:$0xff]  }
 0x4dc   :  { %1463 = vmatpush2.bf16.msra.mxu0 %v3326_v39  ;;  %1421 = vmatprep.subr.bf16.mxu1 %v3327_v40  ;;  %v3374_v39 = vld [vmem:[#allocation2 + $0x248] ss:$12 sps:$4 sm:$0xff]  }
 0x4dd   :  { %1464 = vmatprep.subr.bf16.mxu0 %v3329_v41  ;;  %v3375_v40 = vld [vmem:[#allocation2 + $0x8] ss:$12 sps:$4 sm:$0xff]  }
 0x4de   :  { %v3376_v41 = vld [vmem:[#allocation2 + $0x188] ss:$12 sps:$4 sm:$0xff]  }
 0x4df   :  { %1422 = vmatpush2.bf16.msra.mxu1 %v3331_v42  ;;  %v3379_v42 = vld [vmem:[#allocation2 + $0x3ac] ss:$12 sps:$4 sm:$0xff]  }
 0x4e0   :  { %1465 = vmatpush2.bf16.msra.mxu0 %v3332_v43  ;;  %1423 = vmatprep.subr.bf16.mxu1 %v3333_v44  ;;  %v3382_v43 = vld [vmem:[#allocation2 + $0x52c] ss:$12 sps:$4 sm:$0xff]   ;;  %v3377_v44 = vld [vmem:[#allocation2 + $0x3a8] ss:$12 sps:$4 sm:$0xff]  }
 0x4e1   :  { %1466 = vmatprep.subr.bf16.mxu0 %v3335_v45  ;;  %v3380_v45 = vld [vmem:[#allocation2 + $0x528] ss:$12 sps:$4 sm:$0xff]  }
 0x4e3   :  { %1424 = vmatpush2.bf16.msra.mxu1 %v3337_v46  ;;  %v3385_v46 = vld [vmem:[#allocation2 + $0x394] ss:$12 sps:$4 sm:$0xff]  }
 0x4e4   :  { %1467 = vmatpush2.bf16.msra.mxu0 %v3338_v47  ;;  %1425 = vmatprep.subr.bf16.mxu1 %v3339_v48  ;;  %v3388_v47 = vld [vmem:[#allocation2 + $0x514] ss:$12 sps:$4 sm:$0xff]   ;;  %v3854_v48 = vpack.c.bf16 %v726_v7, %v722_v60  ;;  %v3392_v60 = vld [vmem:[#allocation2 + $0x4f8] ss:$12 sps:$4 sm:$0xff]  }
 0x4e5   :  { %1468 = vmatprep.subr.bf16.mxu0 %v3341_v49  ;;  %v3860_v49 = vpack.c.bf16 %v728_v8, %v724_v61  ;;  %v3397_v61 = vld [vmem:[#allocation2 + $0x364] ss:$12 sps:$4 sm:$0xff]   ;;  %v3398_v7 = vld [vmem:[#allocation2 + $0x4e0] ss:$12 sps:$4 sm:$0xff]  }
 0x4e6   :  { %v3403_v8 = vld [vmem:[#allocation2 + $0x34c] ss:$12 sps:$4 sm:$0xff]  }
 0x4e7   :  { %1426 = vmatpush2.bf16.msra.mxu1 %v3343_v52  ;;  %v3383_v52 = vld [vmem:[#allocation2 + $0x390] ss:$12 sps:$4 sm:$0xff]  }
 0x4e8   :  { %1469 = vmatpush2.bf16.msra.mxu0 %v3344_v53  ;;  %3042 = vmatprep.subr.bf16.mxu1 %v3345_v58  ;;  %v3386_v53 = vld [vmem:[#allocation2 + $0x510] ss:$12 sps:$4 sm:$0xff]  }
 0x4e9   :  { %3064 = vmatprep.subr.bf16.mxu0 %v3346_v59  ;;  %v3391_v58 = vld [vmem:[#allocation2 + $0x37c] ss:$12 sps:$4 sm:$0xff]   ;;  %v3406_v59 = vld [vmem:[#allocation2 + $0x4cc] ss:$12 sps:$4 sm:$0xff]  }
 0x4ea   :  { %1428 = vmatmul.mubr.bf16.vlgmr.msra.gmra.mxu1 %v3838_v2 }
 0x4eb   :  { %1471 = vmatmul.mubr.bf16.vlgmr.msra.gmra.mxu0 %v3844_v15  ;;  %3043 = vmatpush3.bf16.msra.mxu1 %v3347_v1  ;;  %v3401_v1 = vld [vmem:[#allocation2 + $0x348] ss:$12 sps:$4 sm:$0xff]  }
 0x4ec   :  { %3065 = vmatpush3.bf16.msra.mxu0 %v3348_v16  ;;  %3044 = vmatprep.subr.bf16.mxu1 %v3349_v17  ;;  %v3412_v16 = vld [vmem:[#allocation2 + $0x4b4] ss:$12 sps:$4 sm:$0xff]   ;;  %v3407_v17 = vld [vmem:[#allocation2 + $0x330] ss:$12 sps:$4 sm:$0xff]  }
 0x4ed   :  { %3066 = vmatprep.subr.bf16.mxu0 %v3350_v18  ;;  %1513 = vmatprep.mubr.bf16.mxu1 %v3826_v12  ;;  %v3365_v12 = vld [vmem:[#allocation2 + $0xf8] ss:$12 sps:$4 sm:$0xff]   ;;  %v3410_v18 = vld [vmem:[#allocation2 + $0x4b0] ss:$12 sps:$4 sm:$0xff]  }
 0x4ee   :  { %1554 = vmatprep.mubr.bf16.mxu0 %v3828_v14  ;;  %v3366_v14 = vld [vmem:[#allocation2 + $0x278] ss:$12 sps:$4 sm:$0xff]  }
 0x4ef   :  { %3045 = vmatpush3.bf16.msra.mxu1 %v3351_v19  ;;  %v3415_v19 = vld [vmem:[#allocation2 + $0x31c] ss:$12 sps:$4 sm:$0xff]  }
 0x4f0   :  { %3067 = vmatpush3.bf16.msra.mxu0 %v3352_v21  ;;  %3046 = vmatprep.subr.bf16.mxu1 %v3353_v22  ;;  %v3418_v21 = vld [vmem:[#allocation2 + $0x49c] ss:$12 sps:$4 sm:$0xff]   ;;  %v3413_v22 = vld [vmem:[#allocation2 + $0x318] ss:$12 sps:$4 sm:$0xff]  }
 0x4f1   :  { %3068 = vmatprep.subr.bf16.mxu0 %v3354_v25  ;;  %v3416_v25 = vld [vmem:[#allocation2 + $0x498] ss:$12 sps:$4 sm:$0xff]  }
 0x4f3   :  { %3047 = vmatpush3.bf16.msra.mxu1 %v3355_v26  ;;  %v3421_v26 = vld [vmem:[#allocation2 + $0x304] ss:$12 sps:$4 sm:$0xff]  }
 0x4f4   :  { %3069 = vmatpush3.bf16.msra.mxu0 %v3356_v33  ;;  %3048 = vmatprep.subr.bf16.mxu1 %v3357_v34  ;;  %v3424_v33 = vld [vmem:[#allocation2 + $0x484] ss:$12 sps:$4 sm:$0xff]   ;;  %v3419_v34 = vld [vmem:[#allocation2 + $0x300] ss:$12 sps:$4 sm:$0xff]  }
 0x4f5   :  { %3070 = vmatprep.subr.bf16.mxu0 %v3358_v37  ;;  %v3422_v37 = vld [vmem:[#allocation2 + $0x480] ss:$12 sps:$4 sm:$0xff]  }
 0x4f7   :  { %3049 = vmatpush3.bf16.msra.mxu1 %v3359_v38  ;;  %v3427_v38 = vld [vmem:[#allocation2 + $0x46c] ss:$12 sps:$4 sm:$0xff]  }
 0x4f8   :  { %3071 = vmatpush3.bf16.msra.mxu0 %v3360_v20  ;;  %3050 = vmatprep.subr.bf16.mxu1 %v3361_v23  ;;  %v3430_v20 = vld [vmem:[#allocation2 + $0x5ec] ss:$12 sps:$4 sm:$0xff]   ;;  %v3425_v23 = vld [vmem:[#allocation2 + $0x468] ss:$12 sps:$4 sm:$0xff]  }
 0x4f9   :  { %3072 = vmatprep.subr.bf16.mxu0 %v3362_v24  ;;  %v3428_v24 = vld [vmem:[#allocation2 + $0x5e8] ss:$12 sps:$4 sm:$0xff]  }
 0x4fb   :  { %3051 = vmatpush3.bf16.msra.mxu1 %v3363_v27  ;;  %v3433_v27 = vld [vmem:[#allocation2 + $0x454] ss:$12 sps:$4 sm:$0xff]  }
 0x4fc   :  { %3073 = vmatpush3.bf16.msra.mxu0 %v3364_v10  ;;  %3052 = vmatprep.subr.bf16.mxu1 %v3365_v12  ;;  %v3436_v10 = vld [vmem:[#allocation2 + $0x5d4] ss:$12 sps:$4 sm:$0xff]   ;;  %v3431_v12 = vld [vmem:[#allocation2 + $0x450] ss:$12 sps:$4 sm:$0xff]  }
 0x4fd   :  { %3074 = vmatprep.subr.bf16.mxu0 %v3366_v14  ;;  %v3434_v14 = vld [vmem:[#allocation2 + $0x5d0] ss:$12 sps:$4 sm:$0xff]  }
 0x4ff   :  { %3053 = vmatpush3.bf16.msra.mxu1 %v3367_v28  ;;  %v3439_v28 = vld [vmem:[#allocation2 + $0x43c] ss:$12 sps:$4 sm:$0xff]  }
 0x500   :  { %3075 = vmatpush3.bf16.msra.mxu0 %v3368_v29  ;;  %3054 = vmatprep.subr.bf16.mxu1 %v3369_v30  ;;  %v3442_v29 = vld [vmem:[#allocation2 + $0x5bc] ss:$12 sps:$4 sm:$0xff]   ;;  %v3437_v30 = vld [vmem:[#allocation2 + $0x438] ss:$12 sps:$4 sm:$0xff]  }
 0x501   :  { %3076 = vmatprep.subr.bf16.mxu0 %v3370_v31  ;;  %v3440_v31 = vld [vmem:[#allocation2 + $0x5b8] ss:$12 sps:$4 sm:$0xff]  }
 0x503   :  { %3055 = vmatpush3.bf16.msra.mxu1 %v3371_v32  ;;  %v3445_v32 = vld [vmem:[#allocation2 + $0x424] ss:$12 sps:$4 sm:$0xff]  }
 0x504   :  { %3077 = vmatpush3.bf16.msra.mxu0 %v3372_v35  ;;  %3056 = vmatprep.subr.bf16.mxu1 %v3373_v36  ;;  %v3448_v35 = vld [vmem:[#allocation2 + $0x5a4] ss:$12 sps:$4 sm:$0xff]   ;;  %v3443_v36 = vld [vmem:[#allocation2 + $0x420] ss:$12 sps:$4 sm:$0xff]  }
 0x505   :  { %3078 = vmatprep.subr.bf16.mxu0 %v3374_v39  ;;  %v3446_v39 = vld [vmem:[#allocation2 + $0x5a0] ss:$12 sps:$4 sm:$0xff]  }
 0x507   :  { %3057 = vmatpush3.bf16.msra.mxu1 %v3375_v40  ;;  %v3451_v40 = vld [vmem:[#allocation2 + $0x40c] ss:$12 sps:$4 sm:$0xff]  }
 0x508   :  { %3079 = vmatpush3.bf16.msra.mxu0 %v3376_v41  ;;  %2231 = vmatprep.subr.bf16.mxu1 %v3379_v42  ;;  %v3454_v41 = vld [vmem:[#allocation2 + $0x58c] ss:$12 sps:$4 sm:$0xff]   ;;  %v3449_v42 = vld [vmem:[#allocation2 + $0x408] ss:$12 sps:$4 sm:$0xff]  }
 0x509   :  { %2274 = vmatprep.subr.bf16.mxu0 %v3382_v43  ;;  %v3452_v43 = vld [vmem:[#allocation2 + $0x588] ss:$12 sps:$4 sm:$0xff]  }
 0x50a   :  { %1514 = vmatmul.mubr.bf16.vlgmr.msra.gmra.mxu1 %v3838_v2  ;;  %v3404_v2 = vld [vmem:[#allocation2 + $0x4c8] ss:$12 sps:$4 sm:$0xff]  }
 0x50b   :  { %1555 = vmatmul.mubr.bf16.vlgmr.msra.gmra.mxu0 %v3844_v15  ;;  %2232 = vmatpush1.bf16.msra.mxu1 %v3377_v44  ;;  %v3409_v15 = vld [vmem:[#allocation2 + $0x334] ss:$12 sps:$4 sm:$0xff]  }
 0x50c   :  { %2275 = vmatpush1.bf16.msra.mxu0 %v3380_v45  ;;  %2233 = vmatprep.subr.bf16.mxu1 %v3385_v46  ;;  %v3457_v44 = vld [vmem:[#allocation2 + $0x3f4] ss:$12 sps:$4 sm:$0xff]   ;;  %v3455_v46 = vld [vmem:[#allocation2 + $0x3f0] ss:$12 sps:$4 sm:$0xff]  }
 0x50d   :  { %2276 = vmatprep.subr.bf16.mxu0 %v3388_v47  ;;  %2263 = vmatprep.mubr.bf16.mxu1 %v3854_v48  ;;  %v3460_v45 = vld [vmem:[#allocation2 + $0x574] ss:$12 sps:$4 sm:$0xff]   ;;  %v3458_v47 = vld [vmem:[#allocation2 + $0x570] ss:$12 sps:$4 sm:$0xff]  }
 0x50e   :  { %2306 = vmatprep.mubr.bf16.mxu0 %v3860_v49 }
 0x50f   :  { %2234 = vmatpush1.bf16.msra.mxu1 %v3383_v52  ;;  %v3463_v52 = vld [vmem:[#allocation2 + $0x3dc] ss:$12 sps:$4 sm:$0xff]  }
 0x510   :  { %2277 = vmatpush1.bf16.msra.mxu0 %v3386_v53  ;;  %2235 = vmatprep.subr.bf16.mxu1 %v3391_v58  ;;  %v3466_v53 = vld [vmem:[#allocation2 + $0x55c] ss:$12 sps:$4 sm:$0xff]   ;;  %v3461_v58 = vld [vmem:[#allocation2 + $0x3d8] ss:$12 sps:$4 sm:$0xff]  }
 0x511   :  { %2278 = vmatprep.subr.bf16.mxu0 %v3394_v56  ;;  %v3464_v56 = vld [vmem:[#allocation2 + $0x558] ss:$12 sps:$4 sm:$0xff]  }
 0x513   :  { %2236 = vmatpush1.bf16.msra.mxu1 %v3389_v57  ;;  %v3469_v57 = vld [vmem:[#allocation2 + $0x3c4] ss:$12 sps:$4 sm:$0xff]  }
 0x514   :  { %2279 = vmatpush1.bf16.msra.mxu0 %v3392_v60  ;;  %2237 = vmatprep.subr.bf16.mxu1 %v3397_v61  ;;  %v3472_v60 = vld [vmem:[#allocation2 + $0x544] ss:$12 sps:$4 sm:$0xff]   ;;  %v3467_v61 = vld [vmem:[#allocation2 + $0x3c0] ss:$12 sps:$4 sm:$0xff]  }
 0x515   :  { %2280 = vmatprep.subr.bf16.mxu0 %v3400_v5  ;;  %v3470_v5 = vld [vmem:[#allocation2 + $0x540] ss:$12 sps:$4 sm:$0xff]  }
 0x517   :  { %2238 = vmatpush1.bf16.msra.mxu1 %v3395_v6  ;;  %v3473_v6 = vld [vmem:[#allocation2 + $0x470] ss:$12 sps:$4 sm:$0xff]  }
 0x518   :  { %2281 = vmatpush1.bf16.msra.mxu0 %v3398_v7  ;;  %2239 = vmatprep.subr.bf16.mxu1 %v3403_v8  ;;  %v3474_v7 = vld [vmem:[#allocation2 + $0x5f0] ss:$12 sps:$4 sm:$0xff]  }
 0x519   :  { %2282 = vmatprep.subr.bf16.mxu0 %v3406_v59  ;;  %v3475_v8 = vld [vmem:[#allocation2 + $0x3b0] ss:$12 sps:$4 sm:$0xff]  }
 0x51a   :  { %v3476_v59 = vld [vmem:[#allocation2 + $0x530] ss:$12 sps:$4 sm:$0xff]  }
 0x51b   :  { %2240 = vmatpush1.bf16.msra.mxu1 %v3401_v1  ;;  %v3870_v1 = vpack.c.bf16 %v725_v3, %v721_v54  ;;  %v3482_v54 = vld [vmem:[#allocation2 + $0x5c0] ss:$12 sps:$4 sm:$0xff]   ;;  %v3487_v3 = vld [vmem:[#allocation2 + $0x368] ss:$12 sps:$4 sm:$0xff]  }
 0x51c   :  { %2283 = vmatpush1.bf16.msra.mxu0 %v3404_v2  ;;  %2241 = vmatprep.subr.bf16.mxu1 %v3409_v15  ;;  %v3876_v2 = vpack.c.bf16 %v727_v4, %v723_v55  ;;  %v3477_v15 = vld [vmem:[#allocation2 + $0x458] ss:$12 sps:$4 sm:$0xff]   ;;  %v3484_v55 = vld [vmem:[#allocation2 + $0x500] ss:$12 sps:$4 sm:$0xff]   ;;  %v3488_v4 = vld [vmem:[#allocation2 + $0x4e8] ss:$12 sps:$4 sm:$0xff]  }
 0x51d   :  { %2284 = vmatprep.subr.bf16.mxu0 %v3412_v16  ;;  %v3478_v16 = vld [vmem:[#allocation2 + $0x5d8] ss:$12 sps:$4 sm:$0xff]  }
 0x51f   :  { %2242 = vmatpush1.bf16.msra.mxu1 %v3407_v17  ;;  %v3479_v17 = vld [vmem:[#allocation2 + $0x398] ss:$12 sps:$4 sm:$0xff]  }
 0x520   :  { %2285 = vmatpush1.bf16.msra.mxu0 %v3410_v18  ;;  %2243 = vmatprep.subr.bf16.mxu1 %v3415_v19  ;;  %v3480_v18 = vld [vmem:[#allocation2 + $0x518] ss:$12 sps:$4 sm:$0xff]   ;;  %v3489_v19 = vld [vmem:[#allocation2 + $0x410] ss:$12 sps:$4 sm:$0xff]  }
 0x521   :  { %2286 = vmatprep.subr.bf16.mxu0 %v3418_v21  ;;  %v3490_v21 = vld [vmem:[#allocation2 + $0x590] ss:$12 sps:$4 sm:$0xff]  }
 0x523   :  { %2244 = vmatpush1.bf16.msra.mxu1 %v3413_v22  ;;  %v3493_v22 = vld [vmem:[#allocation2 + $0x3f8] ss:$12 sps:$4 sm:$0xff]  }
 0x524   :  { %2287 = vmatpush1.bf16.msra.mxu0 %v3416_v25  ;;  %2245 = vmatprep.subr.bf16.mxu1 %v3421_v26  ;;  %v3494_v25 = vld [vmem:[#allocation2 + $0x578] ss:$12 sps:$4 sm:$0xff]  }
 0x525   :  { %2288 = vmatprep.subr.bf16.mxu0 %v3424_v33  ;;  %v3495_v26 = vld [vmem:[#allocation2 + $0x338] ss:$12 sps:$4 sm:$0xff]  }
 0x526   :  { %v3496_v33 = vld [vmem:[#allocation2 + $0x4b8] ss:$12 sps:$4 sm:$0xff]  }
 0x527   :  { %2246 = vmatpush1.bf16.msra.mxu1 %v3419_v34  ;;  %v3497_v34 = vld [vmem:[#allocation2 + $0x3e0] ss:$12 sps:$4 sm:$0xff]  }
 0x528   :  { %2289 = vmatpush1.bf16.msra.mxu0 %v3422_v37  ;;  %2247 = vmatprep.subr.bf16.mxu1 %v3427_v38  ;;  %v3498_v37 = vld [vmem:[#allocation2 + $0x560] ss:$12 sps:$4 sm:$0xff]  }
 0x529   :  { %2290 = vmatprep.subr.bf16.mxu0 %v3430_v20  ;;  %v3499_v38 = vld [vmem:[#allocation2 + $0x320] ss:$12 sps:$4 sm:$0xff]  }
 0x52a   :  { %v3500_v20 = vld [vmem:[#allocation2 + $0x4a0] ss:$12 sps:$4 sm:$0xff]  }
 0x52b   :  { %2248 = vmatpush2.bf16.msra.mxu1 %v3425_v23  ;;  %v3501_v23 = vld [vmem:[#allocation2 + $0x3c8] ss:$12 sps:$4 sm:$0xff]  }
 0x52c   :  { %2291 = vmatpush2.bf16.msra.mxu0 %v3428_v24  ;;  %2249 = vmatprep.subr.bf16.mxu1 %v3433_v27  ;;  %v3502_v24 = vld [vmem:[#allocation2 + $0x548] ss:$12 sps:$4 sm:$0xff]  }
 0x52d   :  { %2292 = vmatprep.subr.bf16.mxu0 %v3436_v10  ;;  %v3503_v27 = vld [vmem:[#allocation2 + $0x308] ss:$12 sps:$4 sm:$0xff]  }
 0x52e   :  { %v3504_v10 = vld [vmem:[#allocation2 + $0x488] ss:$12 sps:$4 sm:$0xff]  }
 0x52f   :  { %2250 = vmatpush2.bf16.msra.mxu1 %v3431_v12  ;;  %v3505_v12 = vld [vmem:[%s4000_s1 + $0x78] sm:$0xff]  }
 0x530   :  { %2293 = vmatpush2.bf16.msra.mxu0 %v3434_v14  ;;  %2251 = vmatprep.subr.bf16.mxu1 %v3439_v28  ;;  %v3506_v14 = vld [vmem:[%s4000_s1 + $0x38] sm:$0xff]   ;;  %v3507_v28 = vld [vmem:[%s4000_s1 + $0x70] sm:$0xff]  }
 0x531   :  { %2294 = vmatprep.subr.bf16.mxu0 %v3442_v29  ;;  %v3508_v29 = vld [vmem:[%s4000_s1 + $0x30] sm:$0xff]  }
 0x533   :  { %2252 = vmatpush2.bf16.msra.mxu1 %v3437_v30  ;;  %v3509_v30 = vld [vmem:[%s4000_s1 + $0x68] sm:$0xff]  }
 0x534   :  { %2295 = vmatpush2.bf16.msra.mxu0 %v3440_v31  ;;  %2253 = vmatprep.subr.bf16.mxu1 %v3445_v32  ;;  %v3510_v31 = vld [vmem:[%s4000_s1 + $0x28] sm:$0xff]   ;;  %v3511_v32 = vld [vmem:[%s4000_s1 + $0x60] sm:$0xff]  }
 0x535   :  { %2296 = vmatprep.subr.bf16.mxu0 %v3448_v35  ;;  %v3512_v35 = vld [vmem:[%s4000_s1 + $0x20] sm:$0xff]  }
 0x537   :  { %2254 = vmatpush2.bf16.msra.mxu1 %v3443_v36  ;;  %v3513_v36 = vld [vmem:[%s4000_s1 + $0x58] sm:$0xff]  }
 0x538   :  { %2297 = vmatpush2.bf16.msra.mxu0 %v3446_v39  ;;  %2255 = vmatprep.subr.bf16.mxu1 %v3451_v40  ;;  %v3514_v39 = vld [vmem:[%s4000_s1 + $0x18] sm:$0xff]   ;;  %v3515_v40 = vld [vmem:[%s4000_s1 + $0x50] sm:$0xff]  }
 0x539   :  { %2298 = vmatprep.subr.bf16.mxu0 %v3454_v41  ;;  %v3516_v41 = vld [vmem:[%s4000_s1 + $0x10] sm:$0xff]  }
 0x53b   :  { %2256 = vmatpush2.bf16.msra.mxu1 %v3449_v42  ;;  %v3517_v42 = vld [vmem:[%s4000_s1 + $0x48] sm:$0xff]  }
 0x53c   :  { %2299 = vmatpush2.bf16.msra.mxu0 %v3452_v43  ;;  %2257 = vmatprep.subr.bf16.mxu1 %v3457_v44  ;;  %v3518_v43 = vld [vmem:[%s4000_s1 + $0x8] sm:$0xff]   ;;  %v3519_v44 = vld [vmem:[%s4000_s1 + $0x40] sm:$0xff]  }
 0x53d   :  { %2300 = vmatprep.subr.bf16.mxu0 %v3460_v45  ;;  %v3520_v45 = vld [vmem:[%s4000_s1] sm:$0xff]  }
 0x53f   :  { %2258 = vmatpush2.bf16.msra.mxu1 %v3455_v46  ;;  %v3521_v46 = vld [vmem:[%s4000_s1 + $0xb8] sm:$0xff]  }
 0x540   :  { %2301 = vmatpush2.bf16.msra.mxu0 %v3458_v47  ;;  %2259 = vmatprep.subr.bf16.mxu1 %v3463_v52  ;;  %v3522_v47 = vld [vmem:[%s4000_s1 + $0xb0] sm:$0xff]   ;;  %v3523_v52 = vld [vmem:[%s4000_s1 + $0xa8] sm:$0xff]  }
 0x541   :  { %2302 = vmatprep.subr.bf16.mxu0 %v3466_v53  ;;  %v3524_v53 = vld [vmem:[%s4000_s1 + $0xa0] sm:$0xff]  }
 0x543   :  { %2260 = vmatpush2.bf16.msra.mxu1 %v3461_v58  ;;  %v3525_v58 = vld [vmem:[%s4000_s1 + $0x98] sm:$0xff]  }
 0x544   :  { %2303 = vmatpush2.bf16.msra.mxu0 %v3464_v56  ;;  %2261 = vmatprep.subr.bf16.mxu1 %v3469_v57  ;;  %v3526_v56 = vld [vmem:[%s4000_s1 + $0x90] sm:$0xff]   ;;  %v3527_v57 = vld [vmem:[%s4000_s1 + $0x88] sm:$0xff]  }
 0x545   :  { %2304 = vmatprep.subr.bf16.mxu0 %v3472_v60  ;;  %v3528_v60 = vld [vmem:[%s4000_s1 + $0x80] sm:$0xff]  }
 0x547   :  { %2262 = vmatpush2.bf16.msra.mxu1 %v3467_v61 }
 0x548   :  { %2305 = vmatpush2.bf16.msra.mxu0 %v3470_v5  ;;  %3086 = vmatprep.subr.bf16.mxu1 %v3473_v6  ;;  %v2809_v6 = vld [vmem:[%s4001_s0 + $0x5] ss:$8 sm:$0x7] }
 0x549   :  { %3108 = vmatprep.subr.bf16.mxu0 %v3474_v7 }
 0x54a   :  { %2264 = vmatmul.mubr.bf16.vlgmr.msra.gmra.mxu1 %v3870_v1 }
 0x54b   :  { %2307 = vmatmul.mubr.bf16.vlgmr.msra.gmra.mxu0 %v3876_v2  ;;  %3087 = vmatpush3.bf16.msra.mxu1 %v3475_v8  ;;  %v871_v8 = vrot.slane %v2809_v6, %v3772_v9 }
 0x54c   :  { %3109 = vmatpush3.bf16.msra.mxu0 %v3476_v59  ;;  %3088 = vmatprep.subr.bf16.mxu1 %v3477_v15 }
 0x54d   :  { %3110 = vmatprep.subr.bf16.mxu0 %v3478_v16  ;;  %2349 = vmatprep.mubr.bf16.mxu1 %v3854_v48  ;;  %v3491_v48 = vld [vmem:[#allocation2 + $0x350] ss:$12 sps:$4 sm:$0xff]  }
 0x54e   :  { %2390 = vmatprep.mubr.bf16.mxu0 %v3860_v49  ;;  %v3492_v49 = vld [vmem:[#allocation2 + $0x4d0] ss:$12 sps:$4 sm:$0xff]  }
 0x54f   :  { %3089 = vmatpush3.bf16.msra.mxu1 %v3479_v17 }
 0x550   :  { %3111 = vmatpush3.bf16.msra.mxu0 %v3480_v18  ;;  %3090 = vmatprep.subr.bf16.mxu1 %v3481_v50 }
 0x551   :  { %3112 = vmatprep.subr.bf16.mxu0 %v3482_v54  ;;  %v3003_v54 = vld [vmem:[%s4001_s0 + $0x20] ss:$8 sm:$0x7] }
 0x553   :  { %3091 = vmatpush3.bf16.msra.mxu1 %v3483_v51 }
 0x554   :  { %3113 = vmatpush3.bf16.msra.mxu0 %v3484_v55  ;;  %3092 = vmatprep.subr.bf16.mxu1 %v3485_v62 }
 0x555   :  { %3114 = vmatprep.subr.bf16.mxu0 %v3486_v63 }
 0x557   :  { %3093 = vmatpush3.bf16.msra.mxu1 %v3487_v3 }
 0x558   :  { %3115 = vmatpush3.bf16.msra.mxu0 %v3488_v4  ;;  %3094 = vmatprep.subr.bf16.mxu1 %v3489_v19  ;;  %v879_v4 = vrot.slane %v2809_v6, %v3774_v11 }
 0x559   :  { %3116 = vmatprep.subr.bf16.mxu0 %v3490_v21  ;;  %v2412_v21 = vrot.slane %v3003_v54, %v3772_v9 }
 0x55b   :  { %3095 = vmatpush3.bf16.msra.mxu1 %v3491_v48  ;;  %v2416_v48 = vrot.slane %v3003_v54, %v3779_v13 }
 0x55c   :  { %3117 = vmatpush3.bf16.msra.mxu0 %v3492_v49  ;;  %3096 = vmatprep.subr.bf16.mxu1 %v3493_v22 }
 0x55d   :  { %3118 = vmatprep.subr.bf16.mxu0 %v3494_v25 }
 0x55f   :  { %3097 = vmatpush3.bf16.msra.mxu1 %v3495_v26 }
 0x560   :  { %3119 = vmatpush3.bf16.msra.mxu0 %v3496_v33  ;;  %3098 = vmatprep.subr.bf16.mxu1 %v3497_v34 }
 0x561   :  { %3120 = vmatprep.subr.bf16.mxu0 %v3498_v37 }
 0x563   :  { %3099 = vmatpush3.bf16.msra.mxu1 %v3499_v38 }
 0x564   :  { %3121 = vmatpush3.bf16.msra.mxu0 %v3500_v20  ;;  %3100 = vmatprep.subr.bf16.mxu1 %v3501_v23 }
 0x565   :  { %3122 = vmatprep.subr.bf16.mxu0 %v3502_v24 }
 0x567   :  { %3101 = vmatpush3.bf16.msra.mxu1 %v3503_v27 }
 0x568   :  { %3123 = vmatpush3.bf16.msra.mxu0 %v3504_v10  ;;  %3130 = vmatprep.subr.bf16.mxu1 %v3505_v12  ;;  %v2420_v12 = vrot.slane %v3003_v54, %v3774_v11 }
 0x569   :  { %3193 = vmatprep.subr.bf16.mxu0 %v3559_v0 }
 0x56a   :  { %2350 = vmatmul.mubr.bf16.vlgmr.msra.gmra.mxu1 %v3870_v1  ;;  %v875_v1 = vrot.slane %v2809_v6, %v3779_v13 }
 0x56b   :  { %2391 = vmatmul.mubr.bf16.vlgmr.msra.gmra.mxu0 %v3876_v2  ;;  %3131 = vmatpush3.bf16.msra.mxu1 %v3506_v14 }
 0x56c   :  { %3209 = vmatprep.mubr.msk.bf16.mxu0 %vm3560_vm0, %v3559_v0  ;;  %3132 = vmatprep.subr.bf16.mxu1 %v3507_v28 }
 0x56d   :  { %3194 = vmatpush3.bf16.msra.mxu0 %v3521_v46 }
 0x56e   :  { %3195 = vmatprep.subr.bf16.mxu0 %v3559_v0 }
 0x56f   :  { %3133 = vmatpush3.bf16.msra.mxu1 %v3508_v29 }
 0x570   :  { %3134 = vmatprep.subr.bf16.mxu1 %v3509_v30 }
 0x571   :  { %3196 = vmatpush3.bf16.msra.mxu0 %v3522_v47 }
 0x572   :  { %3197 = vmatprep.subr.bf16.mxu0 %v3559_v0 }
 0x573   :  { %3135 = vmatpush3.bf16.msra.mxu1 %v3510_v31 }
 0x574   :  { %3136 = vmatprep.subr.bf16.mxu1 %v3511_v32 }
 0x575   :  { %3198 = vmatpush3.bf16.msra.mxu0 %v3523_v52 }
 0x576   :  { %3199 = vmatprep.subr.bf16.mxu0 %v3559_v0 }
 0x577   :  { %3137 = vmatpush3.bf16.msra.mxu1 %v3512_v35 }
 0x578   :  { %3138 = vmatprep.subr.bf16.mxu1 %v3513_v36 }
 0x579   :  { %3200 = vmatpush3.bf16.msra.mxu0 %v3524_v53  ;;  %v2906_v53 = vld [vmem:[%s4001_s0 + $0x6] ss:$8 sm:$0x7] }
 0x57a   :  { %3201 = vmatprep.subr.bf16.mxu0 %v3559_v0 }
 0x57b   :  { %3139 = vmatpush3.bf16.msra.mxu1 %v3514_v39 }
 0x57c   :  { %3140 = vmatprep.subr.bf16.mxu1 %v3515_v40 }
 0x57d   :  { %3202 = vmatpush3.bf16.msra.mxu0 %v3525_v58  ;;  %v1711_v58 = vrot.slane %v2906_v53, %v3779_v13 }
 0x57e   :  { %3203 = vmatprep.subr.bf16.mxu0 %v3559_v0 }
 0x57f   :  { %3141 = vmatpush3.bf16.msra.mxu1 %v3516_v41 }
 0x580   :  { %3142 = vmatprep.subr.bf16.mxu1 %v3517_v42 }
 0x581   :  { %3204 = vmatpush3.bf16.msra.mxu0 %v3526_v56  ;;  %v1707_v56 = vrot.slane %v2906_v53, %v3772_v9 }
 0x582   :  { %3205 = vmatprep.subr.bf16.mxu0 %v3559_v0 }
 0x583   :  { %3143 = vmatpush3.bf16.msra.mxu1 %v3518_v43 }
 0x584   :  { %3144 = vmatprep.subr.bf16.mxu1 %v3519_v44 }
 0x585   :  { %3206 = vmatpush3.bf16.msra.mxu0 %v3527_v57 }
 0x586   :  { %3207 = vmatprep.subr.bf16.mxu0 %v3559_v0 }
 0x587   :  { %3145 = vmatpush3.bf16.msra.mxu1 %v3520_v45 }
 0x589   :  { %3208 = vmatpush3.bf16.msra.mxu0 %v3528_v60 }
 0x5aa   :  { %v1429_v61 = vpop.f32.mrf.mxu1 }
 0x5ab   :  { %v1472_v5 = vpop.f32.mrf.mxu0  ;;  %v1430_v15 = vadd.f32 %v1429_v61, %v871_v8 }
 0x5ac   :  { %v1431_v7 = vpop.f32.mrf.mxu1 }
 0x5ad   :  { %v1474_v59 = vpop.f32.mrf.mxu0  ;;  %v1432_v16 = vadd.f32 %v1431_v7, %v875_v1  ;;  %v1473_v18 = vadd.f32 %v1472_v5, %v1430_v15 }
 0x5ae   :  { %v1433_v2 = vpop.f32.mrf.mxu1 }
 0x5af   :  { %v1476_v0 = vpop.f32.mrf.mxu0  ;;  %v1475_v51 = vadd.f32 %v1474_v59, %v1432_v16  ;;  %v1434_v3 = vadd.f32 %v1433_v2, %v871_v8  ;;  %v1563_v19 = vmax.f32 %v1473_v18, 0.0 }
 0x5b0   :  { %v1435_v17 = vpop.f32.mrf.mxu1 }
 0x5b1   :  { %v1478_v50 = vpop.f32.mrf.mxu0  ;;  %v1436_v55 = vadd.f32 %v1435_v17, %v875_v1  ;;  %v1564_v25 = vmax.f32 %v1475_v51, 0.0  ;;  %v1477_v20 = vadd.f32 %v1476_v0, %v1434_v3  ;;  %v2424_v24 = vmul.f32 %v2412_v21, %v1563_v19 }
 0x5b3   :  { %v1479_v26 = vadd.f32 %v1478_v50, %v1436_v55  ;;  %v2425_v14 = vmul.f32 %v2416_v48, %v1564_v25  ;;  %v1566_v31 = vmax.f32 %v1477_v20, 0.0 }
 0x5b5   :  { %v1567_v28 = vmax.f32 %v1479_v26, 0.0  ;;  %v2430_v42 = vadd.f32 %v2425_v14, %v2424_v24  ;;  %v2427_v43 = vmul.f32 %v2412_v21, %v1566_v31 }
 0x5b7   :  { %v2428_v39 = vmul.f32 %v2416_v48, %v1567_v28 }
 0x5b9   :  { %v2434_v47 = vadd.f32 %v2428_v39, %v2427_v43  ;;  %v2493_v39 = vld [vmem:[%s4001_s0 + $0x7] ss:$0 sm:$0xff] }
 0x5ca   :  { %v3058_v62 = vpop.f32.mrf.mxu1 }
 0x5cb   :  { %v3080_v63 = vpop.f32.mrf.mxu0 }
 0x5cc   :  { %v3059_v49 = vpop.f32.mrf.mxu1 }
 0x5cd   :  { %v3081_v22 = vpop.f32.mrf.mxu0  ;;  %v3060_v33 = vadd.f32 %v3059_v49, %v3058_v62 }
 0x5ce   :  { %v3082_v34 = vadd.f32 %v3081_v22, %v3080_v63  ;;  %v3061_v37 = vpop.f32.mrf.mxu1 }
 0x5cf   :  { %v3083_v38 = vpop.f32.mrf.mxu0  ;;  %v1516_v23 = vadd.f32 %v3060_v33, %v879_v4 }
 0x5d0   :  { %v3062_v27 = vpop.f32.mrf.mxu1 }
 0x5d1   :  { %v3084_v10 = vpop.f32.mrf.mxu0  ;;  %v1557_v29 = vadd.f32 %v3082_v34, %v1516_v23  ;;  %v3063_v30 = vadd.f32 %v3062_v27, %v3061_v37 }
 0x5d2   :  { %v3085_v36 = vadd.f32 %v3084_v10, %v3083_v38 }
 0x5d3   :  { %v1565_v32 = vmax.f32 %v1557_v29, 0.0  ;;  %v1519_v35 = vadd.f32 %v3063_v30, %v879_v4  ;;  %v1715_v4 = vrot.slane %v2906_v53, %v3774_v11  ;;  %v2407_v11 = vld [vmem:[%s4001_s0 + $0x21] ss:$0 sm:$0xff] }
 0x5d5   :  { %v1560_v40 = vadd.f32 %v3085_v36, %v1519_v35  ;;  %v2426_v41 = vmul.f32 %v2420_v12, %v1565_v32 }
 0x5d7   :  { %v1568_v44 = vmax.f32 %v1560_v40, 0.0  ;;  %v2431_v45 = vadd.f32 %v2430_v42, %v2426_v41 }
 0x5d9   :  { %2432 = vadd.xlane.f32.xlu0 %v2431_v45  ;;  %v2429_v46 = vmul.f32 %v2420_v12, %v1568_v44 }
 0x5db   :  { %v2435_v52 = vadd.f32 %v2434_v47, %v2429_v46 }
 0x5dd   :  { %2436 = vadd.xlane.f32.xlu0 %v2435_v52 }
 0x60a   :  { %v2265_v57 = vpop.f32.mrf.mxu1 }
 0x60b   :  { %v2308_v60 = vpop.f32.mrf.mxu0  ;;  %v2266_v7 = vadd.f32 %v2265_v57, %v1707_v56 }
 0x60c   :  { %v2267_v61 = vpop.f32.mrf.mxu1 }
 0x60d   :  { %v2310_v5 = vpop.f32.mrf.mxu0  ;;  %v2268_v6 = vadd.f32 %v2267_v61, %v1711_v58  ;;  %v2309_v17 = vadd.f32 %v2308_v60, %v2266_v7 }
 0x60e   :  { %v2269_v8 = vpop.f32.mrf.mxu1 }
 0x60f   :  { %v2312_v59 = vpop.f32.mrf.mxu0  ;;  %v2270_v1 = vadd.f32 %v2269_v8, %v1707_v56  ;;  %v2311_v15 = vadd.f32 %v2310_v5, %v2268_v6  ;;  %v2399_v9 = vmax.f32 %v2309_v17, 0.0 }
 0x610   :  { %v2271_v2 = vpop.f32.mrf.mxu1 }
 0x611   :  { %v2313_v0 = vadd.f32 %v2312_v59, %v2270_v1  ;;  %v2272_v16 = vadd.f32 %v2271_v2, %v1711_v58  ;;  %v2314_v18 = vpop.f32.mrf.mxu0  ;;  %v2400_v13 = vmax.f32 %v2311_v15, 0.0 }
 0x613   :  { %v2315_v50 = vadd.f32 %v2314_v18, %v2272_v16  ;;  %v2402_v54 = vmax.f32 %v2313_v0, 0.0 }
 0x615   :  { %v2403_v51 = vmax.f32 %v2315_v50, 0.0  ;;  %v2490_v62 = vpack.c.bf16 %v2402_v54, %v2399_v9 }
 0x617   :  { %v2491_v55 = vpack.c.bf16 %v2403_v51, %v2400_v13 }
 0x619   :  { %2670 = vmatprep.mubr.bf16.mxu1 %v2491_v55 }
 0x61a   :  { %2671 = vmatmul.mubr.bf16.vlgmr.msra.gmra.mxu1 %v2490_v62 }
 0x62a   :  { %v3102_v63 = vpop.f32.mrf.mxu1 }
 0x62b   :  { %v3124_v3 = vpop.f32.mrf.mxu0 }
 0x62c   :  { %v3103_v19 = vpop.f32.mrf.mxu1 }
 0x62d   :  { %v3125_v21 = vpop.f32.mrf.mxu0  ;;  %v3104_v48 = vadd.f32 %v3103_v19, %v3102_v63 }
 0x62e   :  { %v3105_v49 = vpop.f32.mrf.mxu1  ;;  %v3126_v34 = vadd.f32 %v3125_v21, %v3124_v3 }
 0x62f   :  { %v3127_v22 = vpop.f32.mrf.mxu0  ;;  %v2352_v25 = vadd.f32 %v3104_v48, %v1715_v4 }
 0x630   :  { %v3106_v26 = vpop.f32.mrf.mxu1 }
 0x631   :  { %v3128_v33 = vpop.f32.mrf.mxu0  ;;  %v3107_v37 = vadd.f32 %v3106_v26, %v3105_v49  ;;  %v2393_v38 = vadd.f32 %v3126_v34, %v2352_v25 }
 0x632   :  { %v3129_v23 = vadd.f32 %v3128_v33, %v3127_v22 }
 0x633   :  { %v2355_v20 = vadd.f32 %v3107_v37, %v1715_v4  ;;  %v2401_v27 = vmax.f32 %v2393_v38, 0.0 }
 0x635   :  { %v2396_v24 = vadd.f32 %v3129_v23, %v2355_v20 }
 0x637   :  { %v2404_v10 = vmax.f32 %v2396_v24, 0.0 }
 0x639   :  { %v2492_v12 = vpack.c.bf16 %v2404_v10, %v2401_v27 }
 0x63b   :  { %3210 = vmatmul.mubr.bf16.vlgmr.msra.gmra.mxu0 %v2492_v12 }
 0x662   :  { %v2433_v14 = vpop.xlane.xlu0 %2432 }
 0x663   :  { %v2438_v28 = vadd.f32 %v2433_v14, %v2407_v11 }
 0x665   :  { %3529 = vtanh.f32 %v2438_v28 }
 0x666   :  { %v2437_v58 = vpop.xlane.xlu0 %2436 }
 0x667   :  { %v2439_v60 = vadd.f32 %v2437_v58, %v2407_v11 }
 0x669   :  { %3531 = vtanh.f32 %v2439_v60 }
 0x672   :  { %v3530_v29 = vpop.eup %3529 }
 0x673   :  { %2736 = vperm.xlu0 %3247, %v3530_v29  }
 0x676   :  { %v3532_v5 = vpop.eup %3531 }
 0x6da   :  { %v3146_v30 = vpop.f32.mrf.mxu1 }
 0x6dc   :  { %v3147_v31 = vpop.f32.mrf.mxu1 }
 0x6dd   :  { %v3148_v35 = vadd.f32 %v3147_v31, %v3146_v30 }
 0x6de   :  { %v3149_v32 = vpop.f32.mrf.mxu1 }
 0x6df   :  { %v2673_v41 = vadd.f32 %v3148_v35, %v2493_v39 }
 0x6e0   :  { %v3150_v36 = vpop.f32.mrf.mxu1 }
 0x6e1   :  { %v3151_v40 = vadd.f32 %v3150_v36, %v3149_v32 }
 0x6e3   :  { %v2676_v45 = vadd.f32 %v3151_v40, %v2493_v39 }
 0x6ee   :  { %v2737_v15 = vpop.permute.xlu0 %2736 }
 0x6fb   :  { %v2713_v42 = vpop.f32.mrf.mxu0 }
 0x6fc   :  { %v2714_v43 = vadd.f32 %v2713_v42, %v2673_v41 }
 0x6fd   :  { %v3211_v44 = vpop.f32.mrf.mxu0 }
 0x6fe   :  { %v2720_v46 = vmul.f32 %v2714_v43, %v2714_v43 }
 0x6ff   :  { %v2716_v47 = vpop.f32.mrf.mxu0 }
 0x700   :  { %v2717_v52 = vadd.f32 %v2716_v47, %v2676_v45  ;;  %v2722_v53 = vsel %vm94_vm2, %v2720_v46, 0.0 }
 0x701   :  { %v3212_v56 = vpop.f32.mrf.mxu0  ;;  %2723 = vadd.xlane.f32.xlu1 %v2722_v53 }
 0x702   :  { %v2721_v57 = vmul.f32 %v2717_v52, %v2717_v52 }
 0x704   :  { %v2725_v61 = vsel %vm94_vm2, %v2721_v57, 0.0 }
 0x705   :  { %2726 = vadd.xlane.f32.xlu1 %v2725_v61 }
 0x716   :  { %2741 = vperm.xlu1 %3248, %v3532_v5  }
 0x78a   :  { %v2724_v6 = vpop.xlane.xlu1 %2723 }
 0x78b   :  { %v2728_v7 = vmax.f32 %v2724_v6, 1e-24 }
 0x78d   :  { %3533 = vrsqrt.f32 %v2728_v7 }
 0x78e   :  { %v2727_v8 = vpop.xlane.xlu1 %2726 }
 0x78f   :  { %v2729_v59 = vmax.f32 %v2727_v8, 1e-24 }
 0x791   :  { %3535 = vrsqrt.f32 %v2729_v59 }
 0x792   :  { %v2742_v18 = vpop.permute.xlu1 %2741 }
 0x79a   :  { %v3534_v1 = vpop.eup %3533 }
 0x79b   :  { %v2732_v2 = vmul.f32 %v3534_v1, %v2714_v43 }
 0x79d   :  { %v2744_v0 = vsel %vm94_vm2, %v2732_v2, %v2737_v15 }
 0x79e   :  { %v3536_v16 = vpop.eup %3535  ;;  %2746 = vst [vmem:[%s4004_s4] sm:$0xff] %v2744_v0 }
 0x79f   :  { %v2733_v17 = vmul.f32 %v3536_v16, %v2717_v52 }
 0x7a1   :  { %v2745_v50 = vsel %vm94_vm2, %v2733_v17, %v2742_v18 }
 0x7a2   :  { %2747 = vst [vmem:[%s4004_s4 + $0x8] sm:$0xff] %v2745_v50 }
 0x7a3   :  { %2752 = vsyncmov [#allocation3] }
 0x7a6   :  { %s2753_s16 = vpop.sfrf %2752 }
 0x7a7   :  { %p3028_p5 = scmp.ne.s32.totalorder %s2753_s16, 0 }
 0x7a9   :  { %2757 = shalt.err (%p3028_p5)  }

</bundles_post_ra>
